<compile_context>
chip_gen: v5e
topology: v5e:2x2
jax: 0.10.0
libtpu: 0.0.40
codegen_flags: <defaults>
</compile_context>

<pallas_src>
import jax
import jax.numpy as jnp
from jax.experimental import pallas as pl
from jax.experimental.pallas import tpu as pltpu


H = 512
K_IN = 28 * 28          # 784 -- kept unpadded (no f32 padded copy of x)
N_OUT = 10
N_PAD = 128             # logits padded to one full lane group -> lane-dense store


def _round_up(x, m):
    return ((x + m - 1) // m) * m


def mlp_kernel(x_ref, w1_ref, b1_ref, w2_ref, b2_ref, w3_ref, b3_ref, o_ref):
    # Layer 1: (TB, 784) bf16 @ (784, 512) bf16 -> f32 MXU accumulation.
    h1 = jnp.dot(x_ref[...], w1_ref[...], preferred_element_type=jnp.float32)
    # Fused bias + ReLU + downcast: inter-layer activation stored as bf16.
    h1 = jnp.maximum(h1 + b1_ref[...], 0.0).astype(jnp.bfloat16)

    # Layer 2: (TB, 512) @ (512, 512)
    h2 = jnp.dot(h1, w2_ref[...], preferred_element_type=jnp.float32)
    h2 = jnp.maximum(h2 + b2_ref[...], 0.0).astype(jnp.bfloat16)

    # Layer 3 (lane-padded to 128): (TB, 512) @ (512, 128) -> unmasked f32 store.
    logits = jnp.dot(h2, w3_ref[...], preferred_element_type=jnp.float32)
    o_ref[...] = logits + b3_ref[...]


def prepare_params(params):
    """One-time parameter prep, hoisted out of the per-forward path.

    Casts weights to bf16 (native MXU dtype, halves weight DMA), pads the final
    layer to 128 output lanes for a lane-dense store, and reshapes biases to
    (1, N) f32 rows.  Call once; reuse the result for every forward.
    """
    w1 = params["w1"].astype(jnp.bfloat16)                               # (784, 512)
    w2 = params["w2"].astype(jnp.bfloat16)                               # (512, 512)
    w3 = (jnp.zeros((H, N_PAD), jnp.float32)
          .at[:, :N_OUT].set(params["w3"]).astype(jnp.bfloat16))         # (512, 128)
    b1 = params["b1"].reshape(1, H).astype(jnp.float32)
    b2 = params["b2"].reshape(1, H).astype(jnp.float32)
    b3 = (jnp.zeros((1, N_PAD), jnp.float32)
          .at[:, :N_OUT].set(params["b3"].reshape(1, N_OUT)))
    return {"w1": w1, "b1": b1, "w2": w2, "b2": b2, "w3": w3, "b3": b3}


def _choose_batch_tile(B):
    """Batch tile: multiple of 8 sublanes, capped at 512.

    * B <= 256: one tile, padded only to the next multiple of 8.
    * B  > 256: at least 2 grid steps (v7x megacore sharding of the 'parallel'
      batch axis) and TB derived from B so padding waste stays < one tile.
    """
    B8 = _round_up(max(B, 8), 8)
    if B8 <= 256:
        return B8
    TB_MAX = 512                          # ~0.8 MiB bf16 x-tile; low per-step overhead
    n_steps = max(2, -(-B8 // TB_MAX))    # ceil, >= 2 steps
    return _round_up(-(-B8 // n_steps), 8)


def neural_network_forward(x_nchw, prepped):
    """Pallas equivalent of NeuralNetwork.forward.

    x_nchw:  (B, 1, 28, 28) float32
    prepped: output of prepare_params()
    returns: (B, 10) float32 logits
    """
    B = x_nchw.shape[0]
    TB = _choose_batch_tile(B)
    Bp = _round_up(B, TB)

    # nn.Flatten() + a single bf16 cast (fused with the batch pad if needed).
    # x crosses HBM once, at half the f32 width; K stays 784.
    x = x_nchw.reshape(B, K_IN).astype(jnp.bfloat16)
    if Bp != B:
        x = jnp.zeros((Bp, K_IN), jnp.bfloat16).at[:B, :].set(x)

    grid = (Bp // TB,)
    const = lambda i: (0, 0)   # weights/biases: same block every step -> VMEM-resident

    cost = pl.CostEstimate(
        flops=2 * Bp * (K_IN * H + H * H + H * N_PAD),
        transcendentals=0,
        bytes_accessed=(x.size * 2                                       # bf16 x in
                        + (prepped["w1"].size + prepped["w2"].size
                           + prepped["w3"].size) * 2                     # bf16 weights
                        + (prepped["b1"].size + prepped["b2"].size
                           + prepped["b3"].size) * 4                     # f32 biases
                        + Bp * N_PAD * 4),                               # f32 logits out
    )

    out = pl.pallas_call(
        mlp_kernel,
        out_shape=jax.ShapeDtypeStruct((Bp, N_PAD), jnp.float32),
        grid_spec=pltpu.PrefetchScalarGridSpec(
            num_scalar_prefetch=0,
            grid=grid,
            in_specs=[
                pl.BlockSpec((TB, K_IN), lambda i: (i, 0)),   # x tile (pipelined)
                pl.BlockSpec((K_IN, H), const),               # w1 (resident)
                pl.BlockSpec((1, H), const),                  # b1
                pl.BlockSpec((H, H), const),                  # w2
                pl.BlockSpec((1, H), const),                  # b2
                pl.BlockSpec((H, N_PAD), const),              # w3 (lane-padded)
                pl.BlockSpec((1, N_PAD), const),              # b3 (lane-padded)
            ],
            out_specs=pl.BlockSpec((TB, N_PAD), lambda i: (i, 0)),
        ),
        compiler_params=pltpu.CompilerParams(
            dimension_semantics=("parallel",),
        ),
        cost_estimate=cost,
    )(x, prepped["w1"], prepped["b1"], prepped["w2"], prepped["b2"],
      prepped["w3"], prepped["b3"])

    # Strip batch and lane padding -> (B, 10) f32 logits.
    return out[:B, :N_OUT]


def init_params(key):
    """Deterministic init mimicking PyTorch Linear default (U[-1/sqrt(fan_in), +])."""
    def linear(k, fan_in, fan_out):
        kw, kb = jax.random.split(k)
        bound = 1.0 / jnp.sqrt(fan_in)
        w = jax.random.uniform(kw, (fan_in, fan_out), jnp.float32, -bound, bound)
        b = jax.random.uniform(kb, (fan_out,), jnp.float32, -bound, bound)
        return w, b

    k1, k2, k3 = jax.random.split(key, 3)
    w1, b1 = linear(k1, 28 * 28, 512)
    w2, b2 = linear(k2, 512, 512)
    w3, b3 = linear(k3, 512, 10)
    return {"w1": w1, "b1": b1, "w2": w2, "b2": b2, "w3": w3, "b3": b3}


def reference_forward_bf16(x_nchw, params):
    """Pure-JAX reference using the same bf16-operand / f32-accumulate recipe."""
    xf = x_nchw.reshape(x_nchw.shape[0], -1).astype(jnp.float32)
    h = jnp.maximum(
        jnp.dot(xf.astype(jnp.bfloat16), params["w1"].astype(jnp.bfloat16),
                preferred_element_type=jnp.float32) + params["b1"], 0.0)
    h = jnp.maximum(
        jnp.dot(h.astype(jnp.bfloat16), params["w2"].astype(jnp.bfloat16),
                preferred_element_type=jnp.float32) + params["b2"], 0.0)
    return (jnp.dot(h.astype(jnp.bfloat16), params["w3"].astype(jnp.bfloat16),
                    preferred_element_type=jnp.float32) + params["b3"])


if __name__ == "__main__":
    key = jax.random.PRNGKey(0)
    k_params, k_x = jax.random.split(key)

    params = init_params(k_params)
    prepped = prepare_params(params)        # one-time weight prep (hoisted)

    # Small batch of MNIST-shaped inputs, NCHW like PyTorch.
    x = jax.random.normal(k_x, (2, 1, 28, 28), dtype=jnp.float32)

    forward = jax.jit(neural_network_forward)
    logits = jax.block_until_ready(forward(x, prepped))
    assert logits.shape == (2, 10)

    # Tight check vs. a matched bf16-operand / f32-accumulate JAX reference.
    ref_bf16 = reference_forward_bf16(x, params)
    assert jnp.allclose(logits, ref_bf16, atol=1e-3, rtol=1e-3)

    # Loose sanity check vs. the full-f32 PyTorch-style forward (bf16 operand
    # quantization introduces only ~1e-3-scale deviations here).
    xf = x.reshape(x.shape[0], -1)
    h = jnp.maximum(xf @ params["w1"] + params["b1"], 0.0)
    h = jnp.maximum(h @ params["w2"] + params["b2"], 0.0)
    ref_f32 = h @ params["w3"] + params["b3"]
    assert jnp.allclose(logits, ref_f32, atol=5e-2, rtol=5e-2)

    print("KERNEL_OK")
</pallas_src>

<mosaic_0001>
module attributes {stable_mosaic.version = 11 : i64} {
  func.func @mlp_kernel(%arg0: i32, %arg1: memref<8x784xbf16, #tpu.memory_space<vmem>>, %arg2: memref<784x512xbf16, #tpu.memory_space<vmem>>, %arg3: memref<1x512xf32, #tpu.memory_space<vmem>>, %arg4: memref<512x512xbf16, #tpu.memory_space<vmem>>, %arg5: memref<1x512xf32, #tpu.memory_space<vmem>>, %arg6: memref<512x128xbf16, #tpu.memory_space<vmem>>, %arg7: memref<1x128xf32, #tpu.memory_space<vmem>>, %arg8: memref<8x128xf32, #tpu.memory_space<vmem>>) attributes {dimension_semantics = [#tpu.dimension_semantics<parallel>], iteration_bounds = array<i64: 1>, scalar_prefetch = 0 : i64, scratch_operands = 0 : i64, tpu.core_type = #tpu.core_type<tc>, window_params = [{transform_indices = @transform_0, window_bounds = array<i64: 8, 784>}, {pipeline_mode = #tpu.pipeline_mode<synchronous>, transform_indices = @transform_1, window_bounds = array<i64: 784, 512>}, {pipeline_mode = #tpu.pipeline_mode<synchronous>, transform_indices = @transform_2, window_bounds = array<i64: 1, 512>}, {pipeline_mode = #tpu.pipeline_mode<synchronous>, transform_indices = @transform_3, window_bounds = array<i64: 512, 512>}, {pipeline_mode = #tpu.pipeline_mode<synchronous>, transform_indices = @transform_4, window_bounds = array<i64: 1, 512>}, {pipeline_mode = #tpu.pipeline_mode<synchronous>, transform_indices = @transform_5, window_bounds = array<i64: 512, 128>}, {pipeline_mode = #tpu.pipeline_mode<synchronous>, transform_indices = @transform_6, window_bounds = array<i64: 1, 128>}, {transform_indices = @transform_7, window_bounds = array<i64: 8, 128>}]} {
    %c0 = arith.constant 0 : index
    %c0_0 = arith.constant 0 : index
    %0 = vector.load %arg1[%c0, %c0_0] : memref<8x784xbf16, #tpu.memory_space<vmem>>, vector<8x784xbf16>
    %c0_1 = arith.constant 0 : index
    %c0_2 = arith.constant 0 : index
    %1 = vector.load %arg2[%c0_1, %c0_2] : memref<784x512xbf16, #tpu.memory_space<vmem>>, vector<784x512xbf16>
    %cst = arith.constant dense<0.000000e+00> : vector<8x512xf32>
    %2 = tpu.matmul %0, %1, %cst {dimension_numbers = #tpu.dot_dimension_numbers<[1], [0], [0], [1], [0, 0, 1, 1], [], []>} : vector<8x784xbf16>, vector<784x512xbf16>, vector<8x512xf32> -> vector<8x512xf32>
    %c0_3 = arith.constant 0 : index
    %c0_4 = arith.constant 0 : index
    %3 = vector.load %arg3[%c0_3, %c0_4] : memref<1x512xf32, #tpu.memory_space<vmem>>, vector<1x512xf32>
    %4 = vector.broadcast %3 : vector<1x512xf32> to vector<8x512xf32>
    %5 = arith.addf %2, %4 : vector<8x512xf32>
    %cst_5 = arith.constant 0.000000e+00 : f32
    %6 = vector.broadcast %cst_5 : f32 to vector<8x512xf32>
    %7 = arith.maximumf %5, %6 : vector<8x512xf32>
    %8 = arith.truncf %7 : vector<8x512xf32> to vector<8x512xbf16>
    %c0_6 = arith.constant 0 : index
    %c0_7 = arith.constant 0 : index
    %9 = vector.load %arg4[%c0_6, %c0_7] : memref<512x512xbf16, #tpu.memory_space<vmem>>, vector<512x512xbf16>
    %cst_8 = arith.constant dense<0.000000e+00> : vector<8x512xf32>
    %10 = tpu.matmul %8, %9, %cst_8 {dimension_numbers = #tpu.dot_dimension_numbers<[1], [0], [0], [1], [0, 0, 1, 1], [], []>} : vector<8x512xbf16>, vector<512x512xbf16>, vector<8x512xf32> -> vector<8x512xf32>
    %c0_9 = arith.constant 0 : index
    %c0_10 = arith.constant 0 : index
    %11 = vector.load %arg5[%c0_9, %c0_10] : memref<1x512xf32, #tpu.memory_space<vmem>>, vector<1x512xf32>
    %12 = vector.broadcast %11 : vector<1x512xf32> to vector<8x512xf32>
    %13 = arith.addf %10, %12 : vector<8x512xf32>
    %cst_11 = arith.constant 0.000000e+00 : f32
    %14 = vector.broadcast %cst_11 : f32 to vector<8x512xf32>
    %15 = arith.maximumf %13, %14 : vector<8x512xf32>
    %16 = arith.truncf %15 : vector<8x512xf32> to vector<8x512xbf16>
    %c0_12 = arith.constant 0 : index
    %c0_13 = arith.constant 0 : index
    %17 = vector.load %arg6[%c0_12, %c0_13] : memref<512x128xbf16, #tpu.memory_space<vmem>>, vector<512x128xbf16>
    %cst_14 = arith.constant dense<0.000000e+00> : vector<8x128xf32>
    %18 = tpu.matmul %16, %17, %cst_14 {dimension_numbers = #tpu.dot_dimension_numbers<[1], [0], [0], [1], [0, 0, 1, 1], [], []>} : vector<8x512xbf16>, vector<512x128xbf16>, vector<8x128xf32> -> vector<8x128xf32>
    %c0_15 = arith.constant 0 : index
    %c0_16 = arith.constant 0 : index
    %19 = vector.load %arg7[%c0_15, %c0_16] : memref<1x128xf32, #tpu.memory_space<vmem>>, vector<1x128xf32>
    %20 = vector.broadcast %19 : vector<1x128xf32> to vector<8x128xf32>
    %21 = arith.addf %18, %20 : vector<8x128xf32>
    %c0_17 = arith.constant 0 : index
    %c0_18 = arith.constant 0 : index
    %22 = vector.load %arg8[%c0_17, %c0_18] : memref<8x128xf32, #tpu.memory_space<vmem>>, vector<8x128xf32>
    tpu.vector_store %arg8[%c0_17, %c0_18], %21 {strides = array<i32>} : memref<8x128xf32, #tpu.memory_space<vmem>>, vector<8x128xf32>,
    return
  }
  func.func @transform_0(%arg0: i32) -> (i32, i32) {
    %c0_i32 = arith.constant 0 : i32
    %c0_i32_0 = arith.constant 0 : i32
    return %arg0, %c0_i32 : i32, i32
  }
  func.func @transform_1(%arg0: i32) -> (i32, i32) {
    %c0_i32 = arith.constant 0 : i32
    %c0_i32_0 = arith.constant 0 : i32
    %c0_i32_1 = arith.constant 0 : i32
    return %c0_i32, %c0_i32_0 : i32, i32
  }
  func.func @transform_2(%arg0: i32) -> (i32, i32) {
    %c0_i32 = arith.constant 0 : i32
    %c0_i32_0 = arith.constant 0 : i32
    %c0_i32_1 = arith.constant 0 : i32
    return %c0_i32, %c0_i32_0 : i32, i32
  }
  func.func @transform_3(%arg0: i32) -> (i32, i32) {
    %c0_i32 = arith.constant 0 : i32
    %c0_i32_0 = arith.constant 0 : i32
    %c0_i32_1 = arith.constant 0 : i32
    return %c0_i32, %c0_i32_0 : i32, i32
  }
  func.func @transform_4(%arg0: i32) -> (i32, i32) {
    %c0_i32 = arith.constant 0 : i32
    %c0_i32_0 = arith.constant 0 : i32
    %c0_i32_1 = arith.constant 0 : i32
    return %c0_i32, %c0_i32_0 : i32, i32
  }
  func.func @transform_5(%arg0: i32) -> (i32, i32) {
    %c0_i32 = arith.constant 0 : i32
    %c0_i32_0 = arith.constant 0 : i32
    %c0_i32_1 = arith.constant 0 : i32
    return %c0_i32, %c0_i32_0 : i32, i32
  }
  func.func @transform_6(%arg0: i32) -> (i32, i32) {
    %c0_i32 = arith.constant 0 : i32
    %c0_i32_0 = arith.constant 0 : i32
    %c0_i32_1 = arith.constant 0 : i32
    return %c0_i32, %c0_i32_0 : i32, i32
  }
  func.func @transform_7(%arg0: i32) -> (i32, i32) {
    %c0_i32 = arith.constant 0 : i32
    %c0_i32_0 = arith.constant 0 : i32
    return %arg0, %c0_i32 : i32, i32
  }
}

</mosaic_0001>

<bundles_post_ra>
// kernel: neural_network_forward.1
= control target key start
LH: loop header
LB: loop body
LE: loop exit
PB: predicated region body
PF: predicated region fallthrough
CT: control target
= control target key end

     0   :  { %12 = vsyncpa [#allocation3], 0  ;;  %s5058_s0 = inlined_call_operand.vmem [shape: bf16[8,784], index: 0, kind: input, shape index: {}]   ;;  %s5059_s1 = inlined_call_operand.hbm [shape: bf16[784,512], index: 1, kind: input, shape index: {}]   ;;  %s5060_s2 = inlined_call_operand.vmem [shape: f32[1,512], index: 2, kind: input, shape index: {}]   ;;  %s5061_s3 = inlined_call_operand.hbm [shape: bf16[512,512], index: 3, kind: input, shape index: {}]   ;;  %s5062_s4 = inlined_call_operand.vmem [shape: f32[1,512], index: 4, kind: input, shape index: {}]   ;;  %s5063_s5 = inlined_call_operand.hbm [shape: bf16[512,128], index: 5, kind: input, shape index: {}]   ;;  %s5064_s6 = inlined_call_operand.vmem [shape: f32[1,128], index: 6, kind: input, shape index: {}]   ;;  %s5065_s7 = inlined_call_operand.vmem [shape: f32[8,128], index: 7, kind: output, shape index: {}]  }
   0x1   :  { %13 = vsyncpa [#allocation5], 0  ;;  %s35_s26 = sshll.u32 %s5061_s3, 4  ;;  %s4845_s27 = smov [#allocation4]   ;;  %s36_s26 = int_to_ptr.hbm [resolvable:$true] %s35_s26 }
   0x2   :  { %s37_s28 = sshll.u32 %s4845_s27, 4  ;;  %s20_s8 = sshll.u32 %s5059_s1, 4  ;;  %s38_s28 = int_to_ptr.vmem [resolvable:$true] %s37_s28  ;;  %s21_s8 = int_to_ptr.hbm [resolvable:$true] %s20_s8 }
   0x3   :  { %s4846_s9 = smov 256   ;;  %s4847_s10 = smov 16  }
   0x4   :  { %43 = dma.hbm_to_vmem [thread:$0]  %s36_s26, 16384, %s38_s28, [#allocation5], %s4846_s9, %s4846_s9, %s4847_s10  }
   0x5   :  { %s4848_s11 = smov [#allocation2]   ;;  %s50_s15 = sshll.u32 %s5063_s5, 4  ;;  %s51_s15 = int_to_ptr.hbm [resolvable:$true] %s50_s15 }
   0x6   :  { %s22_s12 = sshll.u32 %s4848_s11, 4  ;;  %s4849_s3 = smov [#allocation6]   ;;  %s23_s12 = int_to_ptr.vmem [resolvable:$true] %s22_s12 }
   0x7   :  { %28 = dma.hbm_to_vmem [thread:$0]  %s21_s8, 25088, %s23_s12, [#allocation3], %s4846_s9, %s4846_s9, %s4847_s10  }
   0x8   :  { %s52_s16 = sshll.u32 %s4849_s3, 4  ;;  %s4850_s17 = smov 64   ;;  %s53_s16 = int_to_ptr.vmem [resolvable:$true] %s52_s16 }
   0x9   :  { %s4851_s18 = smov 4  }
   0xa   :  { %58 = dma.hbm_to_vmem [thread:$0]  %s51_s15, 4096, %s53_s16, [#allocation5], %s4850_s17, %s4850_s17, %s4851_s18  }
   0xb   :  { %4841 = dma.done.wait [#allocation3], 25088  }
   0xc   :  { %4842 = vsyncadd [#allocation3], 4294942208 }
   0xd   :  { %4843 = dma.done.wait [#allocation5], 20480  }
   0xe   :  { %4844 = vsyncadd [#allocation5], 4294946816  ;;  %v3091_v0 = vld [vmem:[#allocation2 + $0xe0] sm:$0xf]  ;;  %v4435_v1 = vld [vmem:[#allocation2 + $0xec] sm:$0xf0] }
   0xf   :  { %v3219_v2 = vld [vmem:[#allocation2 + $0x1e0] sm:$0xf]  ;;  %v3092_v3 = vor.u32 %v4435_v1, %v3091_v0  ;;  %v4467_v4 = vld [vmem:[#allocation2 + $0x1ec] sm:$0xf0]  ;;  %vm1288_vm0 = vcmask 130048  }
  0x10   :  { %v3347_v5 = vld [vmem:[#allocation2 + $0x2e0] sm:$0xf]  ;;  %v4499_v6 = vld [vmem:[#allocation2 + $0x2ec] sm:$0xf0]  ;;  %v3220_v7 = vor.u32 %v4467_v4, %v3219_v2 }
  0x11   :  { %v3348_v8 = vor.u32 %v4499_v6, %v3347_v5  ;;  %v3475_v9 = vld [vmem:[#allocation2 + $0x3e0] sm:$0xf]  ;;  %v4531_v10 = vld [vmem:[#allocation2 + $0x3ec] sm:$0xf0]  ;;  %1292 = vmatpush.bf16.msra.mxu0 %v3092_v3 }
  0x12   :  { %v3075_v11 = vld [vmem:[#allocation2 + $0xc0] sm:$0xf]  ;;  %v3476_v12 = vor.u32 %v4531_v10, %v3475_v9  ;;  %v4431_v13 = vld [vmem:[#allocation2 + $0xcc] sm:$0xf0]  ;;  %1305 = vmatpush.bf16.msra.mxu1 %v3220_v7 }
  0x13   :  { %v3203_v14 = vld [vmem:[#allocation2 + $0x1c0] sm:$0xf]  ;;  %v4463_v15 = vld [vmem:[#allocation2 + $0x1cc] sm:$0xf0]  ;;  %1318 = vmatpush.bf16.msra.mxu2 %v3348_v8  ;;  %v3076_v16 = vor.u32 %v4431_v13, %v3075_v11 }
  0x14   :  { %v3204_v17 = vor.u32 %v4463_v15, %v3203_v14  ;;  %v3331_v18 = vld [vmem:[#allocation2 + $0x2c0] sm:$0xf]  ;;  %v4495_v19 = vld [vmem:[#allocation2 + $0x2cc] sm:$0xf0]  ;;  %1331 = vmatpush.bf16.msra.mxu3 %v3476_v12 }
  0x15   :  { %v3459_v20 = vld [vmem:[#allocation2 + $0x3c0] sm:$0xf]  ;;  %v3332_v21 = vor.u32 %v4495_v19, %v3331_v18  ;;  %v4527_v22 = vld [vmem:[#allocation2 + $0x3cc] sm:$0xf0]  ;;  %1293 = vmatpush.bf16.msra.mxu0 %v3076_v16 }
  0x16   :  { %v3059_v23 = vld [vmem:[#allocation2 + $0xa0] sm:$0xf]  ;;  %v4427_v24 = vld [vmem:[#allocation2 + $0xac] sm:$0xf0]  ;;  %v3460_v25 = vor.u32 %v4527_v22, %v3459_v20  ;;  %1306 = vmatpush.bf16.msra.mxu1 %v3204_v17 }
  0x17   :  { %v3187_v26 = vld [vmem:[#allocation2 + $0x1a0] sm:$0xf]  ;;  %v4459_v27 = vld [vmem:[#allocation2 + $0x1ac] sm:$0xf0]  ;;  %v3060_v29 = vor.u32 %v4427_v24, %v3059_v23  ;;  %1319 = vmatpush.bf16.msra.mxu2 %v3332_v21 }
  0x18   :  { %v3315_v28 = vld [vmem:[#allocation2 + $0x2a0] sm:$0xf]  ;;  %v4491_v30 = vld [vmem:[#allocation2 + $0x2ac] sm:$0xf0]  ;;  %v3188_v33 = vor.u32 %v4459_v27, %v3187_v26  ;;  %1332 = vmatpush.bf16.msra.mxu3 %v3460_v25  ;;  %v75_v25 = vld [vmem:[%s5058_s0 + $0x8] sm:$0xff] }
  0x19   :  { %v3443_v31 = vld [vmem:[#allocation2 + $0x3a0] sm:$0xf]  ;;  %v4523_v32 = vld [vmem:[#allocation2 + $0x3ac] sm:$0xf0]  ;;  %v3316_v34 = vor.u32 %v4491_v30, %v3315_v28  ;;  %1294 = vmatpush.bf16.msra.mxu0 %v3060_v29 }
  0x1a   :  { %v3043_v35 = vld [vmem:[#allocation2 + $0x80] sm:$0xf]  ;;  %v4423_v36 = vld [vmem:[#allocation2 + $0x8c] sm:$0xf0]  ;;  %v3444_v38 = vor.u32 %v4523_v32, %v3443_v31  ;;  %1307 = vmatpush.bf16.msra.mxu1 %v3188_v33 }
  0x1b   :  { %v3171_v37 = vld [vmem:[#allocation2 + $0x180] sm:$0xf]  ;;  %v4455_v39 = vld [vmem:[#allocation2 + $0x18c] sm:$0xf0]  ;;  %v3044_v44 = vor.u32 %v4423_v36, %v3043_v35  ;;  %1320 = vmatpush.bf16.msra.mxu2 %v3316_v34  ;;  %v4433_v34 = vld [vmem:[#allocation2 + $0xe4] sm:$0xf]  ;;  %v290_v36 = vunpack.c.l.b16 %v75_v25 }
  0x1c   :  { %v3299_v40 = vld [vmem:[#allocation2 + $0x280] sm:$0xf]  ;;  %v4487_v41 = vld [vmem:[#allocation2 + $0x28c] sm:$0xf0]  ;;  %v3172_v45 = vor.u32 %v4455_v39, %v3171_v37  ;;  %1333 = vmatpush.bf16.msra.mxu3 %v3444_v38  ;;  %v3093_v35 = vld [vmem:[#allocation2 + $0xf0] sm:$0xf0] }
  0x1d   :  { %v3427_v42 = vld [vmem:[#allocation2 + $0x380] sm:$0xf]  ;;  %v4519_v43 = vld [vmem:[#allocation2 + $0x38c] sm:$0xf0]  ;;  %v3300_v46 = vor.u32 %v4487_v41, %v3299_v40  ;;  %1295 = vmatpush.bf16.msra.mxu0 %v3044_v44 }
  0x1e   :  { %v3027_v47 = vld [vmem:[#allocation2 + $0x60] sm:$0xf]  ;;  %v4419_v48 = vld [vmem:[#allocation2 + $0x6c] sm:$0xf0]  ;;  %v3428_v50 = vor.u32 %v4519_v43, %v3427_v42  ;;  %1308 = vmatpush.bf16.msra.mxu1 %v3172_v45  ;;  %v291_v42 = vunpack.c.h.b16 %v75_v25  ;;  %v4453_v25 = vld [vmem:[#allocation2 + $0x184] sm:$0xf] }
  0x1f   :  { %v3155_v49 = vld [vmem:[#allocation2 + $0x160] sm:$0xf]  ;;  %v4451_v51 = vld [vmem:[#allocation2 + $0x16c] sm:$0xf0]  ;;  %v3028_v56 = vor.u32 %v4419_v48, %v3027_v47  ;;  %1321 = vmatpush.bf16.msra.mxu2 %v3300_v46  ;;  %v4465_v46 = vld [vmem:[#allocation2 + $0x1e4] sm:$0xf] }
  0x20   :  { %v3283_v52 = vld [vmem:[#allocation2 + $0x260] sm:$0xf]  ;;  %v4483_v53 = vld [vmem:[#allocation2 + $0x26c] sm:$0xf0]  ;;  %v3156_v57 = vor.u32 %v4451_v51, %v3155_v49  ;;  %1334 = vmatpush.bf16.msra.mxu3 %v3428_v50  ;;  %v3221_v47 = vld [vmem:[#allocation2 + $0x1f0] sm:$0xf0]  ;;  %v3096_v49 = vor.u32 %v4433_v34, %v3093_v35 }
  0x21   :  { %v3411_v54 = vld [vmem:[#allocation2 + $0x360] sm:$0xf]  ;;  %v4515_v55 = vld [vmem:[#allocation2 + $0x36c] sm:$0xf0]  ;;  %v3284_v58 = vor.u32 %v4483_v53, %v3283_v52  ;;  %1296 = vmatpush.bf16.msra.mxu0 %v3028_v56  ;;  %v4907_v53 = vpack.c.b16 %v290_v36, %v290_v36  ;;  %v3077_v56 = vld [vmem:[#allocation2 + $0xd0] sm:$0xf0] }
  0x22   :  { %v3011_v59 = vld [vmem:[#allocation2 + $0x40] sm:$0xf]  ;;  %v4415_v60 = vld [vmem:[#allocation2 + $0x4c] sm:$0xf0]  ;;  %v3412_v62 = vor.u32 %v4515_v55, %v3411_v54  ;;  %1309 = vmatpush.bf16.msra.mxu1 %v3156_v57  ;;  %v4429_v55 = vld [vmem:[#allocation2 + $0xc4] sm:$0xf] }
  0x23   :  { %v3139_v61 = vld [vmem:[#allocation2 + $0x140] sm:$0xf]  ;;  %v4447_v63 = vld [vmem:[#allocation2 + $0x14c] sm:$0xf0]  ;;  %v3012_v4 = vor.u32 %v4415_v60, %v3011_v59  ;;  %1322 = vmatpush.bf16.msra.mxu2 %v3284_v58  ;;  %v4911_v60 = vpack.c.b16 %v291_v42, %v291_v42  ;;  %v3029_v34 = vld [vmem:[#allocation2 + $0x70] sm:$0xf0] }
  0x24   :  { %v3267_v0 = vld [vmem:[#allocation2 + $0x240] sm:$0xf]  ;;  %v4479_v1 = vld [vmem:[#allocation2 + $0x24c] sm:$0xf0]  ;;  %v3140_v5 = vor.u32 %v4447_v63, %v3139_v61  ;;  %1335 = vmatpush.bf16.msra.mxu3 %v3412_v62  ;;  %v3224_v61 = vor.u32 %v4465_v46, %v3221_v47  ;;  %v4461_v63 = vld [vmem:[#allocation2 + $0x1c4] sm:$0xf] }
  0x25   :  { %v3395_v2 = vld [vmem:[#allocation2 + $0x340] sm:$0xf]  ;;  %v4511_v3 = vld [vmem:[#allocation2 + $0x34c] sm:$0xf0]  ;;  %v3268_v6 = vor.u32 %v4479_v1, %v3267_v0  ;;  %1297 = vmatpush.bf16.msra.mxu0 %v3012_v4  ;;  %v3205_v0 = vld [vmem:[#allocation2 + $0x1d0] sm:$0xf0] }
  0x26   :  { %v2995_v7 = vld [vmem:[#allocation2 + $0x20] sm:$0xf]  ;;  %v4411_v8 = vld [vmem:[#allocation2 + $0x2c] sm:$0xf0]  ;;  %v3396_v10 = vor.u32 %v4511_v3, %v3395_v2  ;;  %1310 = vmatpush.bf16.msra.mxu1 %v3140_v5  ;;  %v3080_v2 = vor.u32 %v4429_v55, %v3077_v56  ;;  %v4413_v46 = vld [vmem:[#allocation2 + $0x44] sm:$0xf] }
  0x27   :  { %v3123_v9 = vld [vmem:[#allocation2 + $0x120] sm:$0xf]  ;;  %v4443_v11 = vld [vmem:[#allocation2 + $0x12c] sm:$0xf0]  ;;  %v2996_v17 = vor.u32 %v4411_v8, %v2995_v7  ;;  %1323 = vmatpush.bf16.msra.mxu2 %v3268_v6  ;;  %v4425_v7 = vld [vmem:[#allocation2 + $0xa4] sm:$0xf] }
  0x28   :  { %v3251_v12 = vld [vmem:[#allocation2 + $0x220] sm:$0xf]  ;;  %v4475_v13 = vld [vmem:[#allocation2 + $0x22c] sm:$0xf0]  ;;  %v3124_v21 = vor.u32 %v4443_v11, %v3123_v9  ;;  %1336 = vmatpush.bf16.msra.mxu3 %v3396_v10  ;;  %v3061_v8 = vld [vmem:[#allocation2 + $0xb0] sm:$0xf0]  ;;  %v3208_v10 = vor.u32 %v4461_v63, %v3205_v0 }
  0x29   :  { %v3379_v14 = vld [vmem:[#allocation2 + $0x320] sm:$0xf]  ;;  %v4507_v15 = vld [vmem:[#allocation2 + $0x32c] sm:$0xf0]  ;;  %v3252_v22 = vor.u32 %v4475_v13, %v3251_v12  ;;  %1298 = vmatpush.bf16.msra.mxu0 %v2996_v17  ;;  %v4457_v12 = vld [vmem:[#allocation2 + $0x1a4] sm:$0xf] }
  0x2a   :  { %v2979_v16 = vld [vmem:[#allocation2] sm:$0xf]  ;;  %v4407_v18 = vld [vmem:[#allocation2 + $0xc] sm:$0xf0]  ;;  %v3380_v26 = vor.u32 %v4507_v15, %v3379_v14  ;;  %1311 = vmatpush.bf16.msra.mxu1 %v3124_v21  ;;  %v3189_v13 = vld [vmem:[#allocation2 + $0x1b0] sm:$0xf0]  ;;  %v3064_v15 = vor.u32 %v4425_v7, %v3061_v8 }
  0x2b   :  { %v3107_v19 = vld [vmem:[#allocation2 + $0x100] sm:$0xf]  ;;  %v4439_v20 = vld [vmem:[#allocation2 + $0x10c] sm:$0xf0]  ;;  %v2980_v33 = vor.u32 %v4407_v18, %v2979_v16  ;;  %1324 = vmatpush.bf16.msra.mxu2 %v3252_v22  ;;  %v3045_v21 = vld [vmem:[#allocation2 + $0x90] sm:$0xf0] }
  0x2c   :  { %v3235_v23 = vld [vmem:[#allocation2 + $0x200] sm:$0xf]  ;;  %v4471_v24 = vld [vmem:[#allocation2 + $0x20c] sm:$0xf0]  ;;  %v3108_v38 = vor.u32 %v4439_v20, %v3107_v19  ;;  %1337 = vmatpush.bf16.msra.mxu3 %v3380_v26  ;;  %v4421_v20 = vld [vmem:[#allocation2 + $0x84] sm:$0xf] }
  0x2d   :  { %v3363_v27 = vld [vmem:[#allocation2 + $0x300] sm:$0xf]  ;;  %v4503_v28 = vld [vmem:[#allocation2 + $0x30c] sm:$0xf0]  ;;  %v3236_v39 = vor.u32 %v4471_v24, %v3235_v23  ;;  %1299 = vmatpush.bf16.msra.mxu0 %v2980_v33  ;;  %v77_v22 = vld [vmem:[%s5058_s0 + $0x18] sm:$0xf]  ;;  %v3192_v23 = vor.u32 %v4457_v12, %v3189_v13 }
  0x2e   :  { %v3603_v29 = vld [vmem:[#allocation2 + $0x4e0] sm:$0xf]  ;;  %v4563_v30 = vld [vmem:[#allocation2 + $0x4ec] sm:$0xf0]  ;;  %v3364_v43 = vor.u32 %v4503_v28, %v3363_v27  ;;  %1312 = vmatpush.bf16.msra.mxu1 %v3108_v38  ;;  %v3173_v26 = vld [vmem:[#allocation2 + $0x190] sm:$0xf0]  ;;  %v3048_v28 = vor.u32 %v4421_v20, %v3045_v21  ;;  %v294_v35 = vunpack.c.l.b16 %v77_v22 }
  0x2f   :  { %v3731_v31 = vld [vmem:[#allocation2 + $0x5e0] sm:$0xf]  ;;  %v4595_v32 = vld [vmem:[#allocation2 + $0x5ec] sm:$0xf0]  ;;  %v3604_v44 = vor.u32 %v4563_v30, %v3603_v29  ;;  %1325 = vmatpush.bf16.msra.mxu2 %v3236_v39  ;;  %v4417_v33 = vld [vmem:[#allocation2 + $0x64] sm:$0xf]  ;;  %v3176_v36 = vor.u32 %v4453_v25, %v3173_v26 }
  0x30   :  { %v74_v37 = vld [vmem:[%s5058_s0] sm:$0xff]  ;;  %v4599_v45 = vld [vmem:[#allocation2 + $0x60c] sm:$0xf0]  ;;  %v3732_v48 = vor.u32 %v4595_v32, %v3731_v31  ;;  %1338 = vmatpush.bf16.msra.mxu3 %v3364_v43  ;;  %v3157_v39 = vld [vmem:[#allocation2 + $0x170] sm:$0xf0] }
  0x31   :  { %v3747_v40 = vld [vmem:[#allocation2 + $0x600] sm:$0xf]  ;;  %v288_v41 = vunpack.c.l.b16 %v74_v37  ;;  %v4559_v51 = vld [vmem:[#allocation2 + $0x4cc] sm:$0xf0]  ;;  %v289_v58 = vunpack.c.h.b16 %v74_v37  ;;  %1344 = vmatpush.bf16.msrb.mxu0 %v3604_v44  ;;  %v4449_v38 = vld [vmem:[#allocation2 + $0x164] sm:$0xf] }
  0x32   :  { %v3587_v50 = vld [vmem:[#allocation2 + $0x4c0] sm:$0xf]  ;;  %v4591_v54 = vld [vmem:[#allocation2 + $0x5cc] sm:$0xf0]  ;;  %v3748_v59 = vor.u32 %v4599_v45, %v3747_v40  ;;  %1357 = vmatpush.bf16.msrb.mxu1 %v3732_v48  ;;  %1326 = vmatmul.bf16.vlgmr.msra.gmra.mxu2 %v4907_v53  ;;  %v3013_v47 = vld [vmem:[#allocation2 + $0x50] sm:$0xf0]  ;;  %v4922_v48 = vpack.c.b16 %v294_v35, %v294_v35 }
  0x33   :  { %v3715_v52 = vld [vmem:[#allocation2 + $0x5c0] sm:$0xf]  ;;  %v4909_v57 = vpack.c.b16 %v288_v41, %v288_v41  ;;  %v3588_v62 = vor.u32 %v4559_v51, %v3587_v50  ;;  %v4555_v4 = vld [vmem:[#allocation2 + $0x4ac] sm:$0xf0]  ;;  %v4915_v9 = vpack.c.b16 %v289_v58, %v289_v58  ;;  %1339 = vmatmul.bf16.vlgmr.msra.gmra.mxu3 %v4911_v60  ;;  %v3032_v41 = vor.u32 %v4417_v33, %v3029_v34  ;;  %v4445_v51 = vld [vmem:[#allocation2 + $0x144] sm:$0xf] }
  0x34   :  { %1383 = vmatpush.bf16.msrb.mxu3 %v3096_v49  ;;  %v3716_v1 = vor.u32 %v4591_v54, %v3715_v52  ;;  %v3571_v3 = vld [vmem:[#allocation2 + $0x4a0] sm:$0xf]  ;;  %v4587_v6 = vld [vmem:[#allocation2 + $0x5ac] sm:$0xf0]  ;;  %1377 = vmatpush.bf16.msrb.mxu2 %v3748_v59  ;;  %v3160_v49 = vor.u32 %v4449_v38, %v3157_v39  ;;  %v3141_v52 = vld [vmem:[#allocation2 + $0x150] sm:$0xf0]  ;;  %v3016_v55 = vor.u32 %v4413_v46, %v3013_v47 }
  0x35   :  { %v3699_v5 = vld [vmem:[#allocation2 + $0x5a0] sm:$0xf]  ;;  %1300 = vmatmul.bf16.vlgmr.msra.gmra.mxu0 %v4909_v57  ;;  %v3572_v11 = vor.u32 %v4555_v4, %v3571_v3  ;;  %v4551_v17 = vld [vmem:[#allocation2 + $0x48c] sm:$0xf0]  ;;  %1313 = vmatmul.bf16.vlgmr.msra.gmra.mxu1 %v4915_v9  ;;  %v2997_v63 = vld [vmem:[#allocation2 + $0x30] sm:$0xf0] }
  0x36   :  { %1345 = vmatpush.bf16.msrb.mxu0 %v3588_v62  ;;  %1358 = vmatpush.bf16.msrb.mxu1 %v3716_v1  ;;  %v3700_v14 = vor.u32 %v4587_v6, %v3699_v5  ;;  %v3555_v16 = vld [vmem:[#allocation2 + $0x480] sm:$0xf]  ;;  %v4583_v19 = vld [vmem:[#allocation2 + $0x58c] sm:$0xf0]  ;;  %v4409_v62 = vld [vmem:[#allocation2 + $0x24] sm:$0xf]  ;;  %v3144_v1 = vor.u32 %v4445_v51, %v3141_v52 }
  0x37   :  { %v3683_v18 = vld [vmem:[#allocation2 + $0x580] sm:$0xf]  ;;  %v3556_v24 = vor.u32 %v4551_v17, %v3555_v16  ;;  %v4547_v30 = vld [vmem:[#allocation2 + $0x46c] sm:$0xf0]  ;;  %v4441_v0 = vld [vmem:[#allocation2 + $0x124] sm:$0xf]  ;;  %v3000_v7 = vor.u32 %v4409_v62, %v2997_v63 }
  0x38   :  { %1396 = vmatpush.bf16.msra.mxu2 %v3224_v61  ;;  %1384 = vmatpush.bf16.msrb.mxu3 %v3080_v2  ;;  %v3684_v27 = vor.u32 %v4583_v19, %v3683_v18  ;;  %v3539_v29 = vld [vmem:[#allocation2 + $0x460] sm:$0xf]  ;;  %v4579_v32 = vld [vmem:[#allocation2 + $0x56c] sm:$0xf0]  ;;  %v3125_v3 = vld [vmem:[#allocation2 + $0x130] sm:$0xf0] }
  0x39   :  { %v3667_v31 = vld [vmem:[#allocation2 + $0x560] sm:$0xf]  ;;  %v3540_v37 = vor.u32 %v4547_v30, %v3539_v29  ;;  %v4543_v43 = vld [vmem:[#allocation2 + $0x44c] sm:$0xf0]  ;;  %v4405_v12 = vld [vmem:[#allocation2 + $0x4] sm:$0xf]  ;;  %v3128_v19 = vor.u32 %v4441_v0, %v3125_v3 }
  0x3a   :  { %1346 = vmatpush.bf16.msrb.mxu0 %v3572_v11  ;;  %1359 = vmatpush.bf16.msrb.mxu1 %v3700_v14  ;;  %v3668_v40 = vor.u32 %v4579_v32, %v3667_v31  ;;  %v3523_v42 = vld [vmem:[#allocation2 + $0x440] sm:$0xf]  ;;  %v4575_v45 = vld [vmem:[#allocation2 + $0x54c] sm:$0xf0]  ;;  %v2981_v13 = vld [vmem:[#allocation2 + $0x10] sm:$0xf0] }
  0x3b   :  { %v3651_v44 = vld [vmem:[#allocation2 + $0x540] sm:$0xf]  ;;  %v3524_v50 = vor.u32 %v4543_v43, %v3523_v42  ;;  %v4539_v58 = vld [vmem:[#allocation2 + $0x42c] sm:$0xf0]  ;;  %v4497_v14 = vld [vmem:[#allocation2 + $0x2e4] sm:$0xf]  ;;  %v2984_v25 = vor.u32 %v4405_v12, %v2981_v13 }
  0x3c   :  { %1397 = vmatpush.bf16.msra.mxu2 %v3208_v10  ;;  %1385 = vmatpush.bf16.msrb.mxu3 %v3064_v15  ;;  %v3652_v54 = vor.u32 %v4575_v45, %v3651_v44  ;;  %v3507_v56 = vld [vmem:[#allocation2 + $0x420] sm:$0xf]  ;;  %v4571_v61 = vld [vmem:[#allocation2 + $0x52c] sm:$0xf0]  ;;  %v3349_v15 = vld [vmem:[#allocation2 + $0x2f0] sm:$0xf0] }
  0x3d   :  { %v3635_v59 = vld [vmem:[#allocation2 + $0x520] sm:$0xf]  ;;  %v3508_v2 = vor.u32 %v4539_v58, %v3507_v56  ;;  %v76_v5 = vld [vmem:[%s5058_s0 + $0x10] sm:$0xff]  ;;  %v4529_v16 = vld [vmem:[#allocation2 + $0x3e4] sm:$0xf] }
  0x3e   :  { %1347 = vmatpush.bf16.msrb.mxu0 %v3556_v24  ;;  %1360 = vmatpush.bf16.msrb.mxu1 %v3684_v27  ;;  %v3491_v4 = vld [vmem:[#allocation2 + $0x400] sm:$0xf]  ;;  %v3636_v6 = vor.u32 %v4571_v61, %v3635_v59  ;;  %v4535_v8 = vld [vmem:[#allocation2 + $0x40c] sm:$0xf0]  ;;  %v3477_v17 = vld [vmem:[#allocation2 + $0x3f0] sm:$0xf0]  ;;  %v292_v18 = vunpack.c.l.b16 %v76_v5 }
  0x3f   :  { %v3619_v10 = vld [vmem:[#allocation2 + $0x500] sm:$0xf]  ;;  %v4567_v11 = vld [vmem:[#allocation2 + $0x50c] sm:$0xf0]  ;;  %v3492_v20 = vor.u32 %v4535_v8, %v3491_v4  ;;  %v4561_v21 = vld [vmem:[#allocation2 + $0x4e4] sm:$0xf]  ;;  %v3480_v29 = vor.u32 %v4529_v16, %v3477_v17 }
  0x40   :  { %1398 = vmatpush.bf16.msra.mxu2 %v3192_v23  ;;  %1386 = vmatpush.bf16.msrb.mxu3 %v3048_v28  ;;  %v3605_v22 = vld [vmem:[#allocation2 + $0x4f0] sm:$0xf0]  ;;  %v293_v23 = vunpack.c.h.b16 %v76_v5  ;;  %v3620_v24 = vor.u32 %v4567_v11, %v3619_v10  ;;  %v4437_v26 = vld [vmem:[#allocation2 + $0x104] sm:$0xf]  ;;  %v3352_v28 = vor.u32 %v4497_v14, %v3349_v15  ;;  %v4929_v34 = vpack.c.b16 %v292_v18, %v292_v18 }
  0x41   :  { %v3109_v27 = vld [vmem:[#allocation2 + $0x110] sm:$0xf0]  ;;  %v4593_v30 = vld [vmem:[#allocation2 + $0x5e4] sm:$0xf]  ;;  %v3608_v33 = vor.u32 %v4561_v21, %v3605_v22 }
  0x42   :  { %1348 = vmatpush.bf16.msrb.mxu0 %v3540_v37  ;;  %1361 = vmatpush.bf16.msrb.mxu1 %v3668_v40  ;;  %v3733_v31 = vld [vmem:[#allocation2 + $0x5f0] sm:$0xf0]  ;;  %v4493_v32 = vld [vmem:[#allocation2 + $0x2c4] sm:$0xf]  ;;  %v3112_v38 = vor.u32 %v4437_v26, %v3109_v27  ;;  %v4931_v39 = vpack.c.b16 %v293_v23, %v293_v23 }
  0x43   :  { %3761 = vmatmul.msk.bf16.vlgmr.msrb.gmra.mxu2 %vm1288_vm0, %v4922_v48  ;;  %v3333_v35 = vld [vmem:[#allocation2 + $0x2d0] sm:$0xf0]  ;;  %v4557_v40 = vld [vmem:[#allocation2 + $0x4c4] sm:$0xf]  ;;  %v3736_v42 = vor.u32 %v4593_v30, %v3733_v31 }
  0x44   :  { %1399 = vmatpush.bf16.msra.mxu2 %v3176_v36  ;;  %1387 = vmatpush.bf16.msrb.mxu3 %v3032_v41  ;;  %v4525_v36 = vld [vmem:[#allocation2 + $0x3c4] sm:$0xf]  ;;  %v3461_v37 = vld [vmem:[#allocation2 + $0x3d0] sm:$0xf0]  ;;  %v3336_v43 = vor.u32 %v4493_v32, %v3333_v35 }
  0x45   :  { %v3589_v41 = vld [vmem:[#allocation2 + $0x4d0] sm:$0xf0]  ;;  %v3464_v44 = vor.u32 %v4525_v36, %v3461_v37  ;;  %v4589_v45 = vld [vmem:[#allocation2 + $0x5c4] sm:$0xf] }
  0x46   :  { %1349 = vmatpush.bf16.msrb.mxu0 %v3524_v50  ;;  %1362 = vmatpush.bf16.msrb.mxu1 %v3652_v54  ;;  %v3717_v46 = vld [vmem:[#allocation2 + $0x5d0] sm:$0xf0]  ;;  %v4489_v47 = vld [vmem:[#allocation2 + $0x2a4] sm:$0xf] }
  0x47   :  { %v3317_v50 = vld [vmem:[#allocation2 + $0x2b0] sm:$0xf0]  ;;  %v4521_v51 = vld [vmem:[#allocation2 + $0x3a4] sm:$0xf]  ;;  %v3720_v56 = vor.u32 %v4589_v45, %v3717_v46 }
  0x48   :  { %1400 = vmatpush.bf16.msra.mxu2 %v3160_v49  ;;  %1388 = vmatpush.bf16.msrb.mxu3 %v3016_v55  ;;  %v3592_v49 = vor.u32 %v4557_v40, %v3589_v41  ;;  %v3445_v52 = vld [vmem:[#allocation2 + $0x3b0] sm:$0xf0]  ;;  %v4553_v54 = vld [vmem:[#allocation2 + $0x4a4] sm:$0xf]  ;;  %v3320_v58 = vor.u32 %v4489_v47, %v3317_v50 }
  0x49   :  { %v3573_v55 = vld [vmem:[#allocation2 + $0x4b0] sm:$0xf0]  ;;  %v3448_v59 = vor.u32 %v4521_v51, %v3445_v52  ;;  %v4585_v61 = vld [vmem:[#allocation2 + $0x5a4] sm:$0xf] }
  0x4a   :  { %1350 = vmatpush.bf16.msrb.mxu0 %v3508_v2  ;;  %1363 = vmatpush.bf16.msrb.mxu1 %v3636_v6  ;;  %v3701_v62 = vld [vmem:[#allocation2 + $0x5b0] sm:$0xf0]  ;;  %v4485_v63 = vld [vmem:[#allocation2 + $0x284] sm:$0xf]  ;;  %v3576_v0 = vor.u32 %v4553_v54, %v3573_v55 }
  0x4b   :  { %v4517_v2 = vld [vmem:[#allocation2 + $0x384] sm:$0xf]  ;;  %v3429_v3 = vld [vmem:[#allocation2 + $0x390] sm:$0xf0]  ;;  %v3704_v6 = vor.u32 %v4585_v61, %v3701_v62  ;;  %v3099_v61 = vld [vmem:[#allocation2 + $0xe8] sm:$0xf] }
  0x4c   :  { %1401 = vmatpush.bf16.msra.mxu2 %v3144_v1  ;;  %1389 = vmatpush.bf16.msrb.mxu3 %v3000_v7  ;;  %v3301_v1 = vld [vmem:[#allocation2 + $0x290] sm:$0xf0]  ;;  %v4549_v4 = vld [vmem:[#allocation2 + $0x484] sm:$0xf]  ;;  %v3432_v8 = vor.u32 %v4517_v2, %v3429_v3  ;;  %v4436_v62 = vld [vmem:[#allocation2 + $0xf4] sm:$0xf0] }
  0x4d   :  { %v3557_v5 = vld [vmem:[#allocation2 + $0x490] sm:$0xf0]  ;;  %v3304_v7 = vor.u32 %v4485_v63, %v3301_v1  ;;  %v4581_v10 = vld [vmem:[#allocation2 + $0x584] sm:$0xf]  ;;  %v3355_v2 = vld [vmem:[#allocation2 + $0x2e8] sm:$0xf] }
  0x4e   :  { %1351 = vmatpush.bf16.msrb.mxu0 %v3492_v20  ;;  %1364 = vmatpush.bf16.msrb.mxu1 %v3620_v24  ;;  %v3685_v11 = vld [vmem:[#allocation2 + $0x590] sm:$0xf0]  ;;  %v4481_v12 = vld [vmem:[#allocation2 + $0x264] sm:$0xf]  ;;  %v3560_v13 = vor.u32 %v4549_v4, %v3557_v5  ;;  %v4500_v3 = vld [vmem:[#allocation2 + $0x2f4] sm:$0xf0] }
  0x4f   :  { %v3285_v14 = vld [vmem:[#allocation2 + $0x270] sm:$0xf0]  ;;  %v4513_v15 = vld [vmem:[#allocation2 + $0x364] sm:$0xf] }
  0x50   :  { %1402 = vmatpush.bf16.msra.mxu2 %v3128_v19  ;;  %1390 = vmatpush.bf16.msrb.mxu3 %v2984_v25  ;;  %v3413_v16 = vld [vmem:[#allocation2 + $0x370] sm:$0xf0]  ;;  %v4545_v17 = vld [vmem:[#allocation2 + $0x464] sm:$0xf]  ;;  %v3688_v19 = vor.u32 %v4581_v10, %v3685_v11  ;;  %v3288_v20 = vor.u32 %v4481_v12, %v3285_v14  ;;  %v3100_v10 = vor.u32 %v4436_v62, %v3099_v61  ;;  %v3483_v11 = vld [vmem:[#allocation2 + $0x3e8] sm:$0xf] }
  0x51   :  { %1352 = vmatmul.bf16.vlgmr.msrb.gmra.mxu0 %v4929_v34  ;;  %1365 = vmatmul.bf16.vlgmr.msrb.gmra.mxu1 %v4931_v39  ;;  %v3541_v18 = vld [vmem:[#allocation2 + $0x470] sm:$0xf0]  ;;  %v3416_v21 = vor.u32 %v4513_v15, %v3413_v16  ;;  %v4577_v22 = vld [vmem:[#allocation2 + $0x564] sm:$0xf]  ;;  %v4532_v12 = vld [vmem:[#allocation2 + $0x3f4] sm:$0xf0]  ;;  %v3356_v16 = vor.u32 %v4500_v3, %v3355_v2 }
  0x52   :  { %1409 = vmatpush.bf16.msra.mxu0 %v3352_v28  ;;  %1422 = vmatpush.bf16.msra.mxu1 %v3480_v29  ;;  %v3669_v23 = vld [vmem:[#allocation2 + $0x570] sm:$0xf0]  ;;  %v4477_v24 = vld [vmem:[#allocation2 + $0x244] sm:$0xf]  ;;  %v3544_v25 = vor.u32 %v4545_v17, %v3541_v18  ;;  %v3227_v14 = vld [vmem:[#allocation2 + $0x1e8] sm:$0xf] }
  0x53   :  { %1391 = vmatmul.bf16.vlgmr.msrb.gmra.mxu3 %v4909_v57  ;;  %v3269_v26 = vld [vmem:[#allocation2 + $0x250] sm:$0xf0]  ;;  %v4509_v27 = vld [vmem:[#allocation2 + $0x344] sm:$0xf]  ;;  %v3672_v31 = vor.u32 %v4577_v22, %v3669_v23  ;;  %v4468_v15 = vld [vmem:[#allocation2 + $0x1f4] sm:$0xf0] }
  0x54   :  { %1435 = vmatpush.bf16.msra.mxu3 %v3608_v33  ;;  %1403 = vmatpush.bf16.msra.mxu2 %v3112_v38  ;;  %v3397_v28 = vld [vmem:[#allocation2 + $0x350] sm:$0xf0]  ;;  %v4541_v29 = vld [vmem:[#allocation2 + $0x444] sm:$0xf]  ;;  %v3272_v33 = vor.u32 %v4477_v24, %v3269_v26  ;;  %v3083_v18 = vld [vmem:[#allocation2 + $0xc8] sm:$0xf]  ;;  %v3228_v23 = vor.u32 %v4468_v15, %v3227_v14 }
  0x55   :  { %v3525_v30 = vld [vmem:[#allocation2 + $0x450] sm:$0xf0]  ;;  %v4573_v32 = vld [vmem:[#allocation2 + $0x544] sm:$0xf]  ;;  %v3400_v35 = vor.u32 %v4509_v27, %v3397_v28  ;;  %v4496_v22 = vld [vmem:[#allocation2 + $0x2d4] sm:$0xf0] }
  0x56   :  { %1410 = vmatpush.bf16.msra.mxu0 %v3336_v43  ;;  %1423 = vmatpush.bf16.msra.mxu1 %v3464_v44  ;;  %v3653_v36 = vld [vmem:[#allocation2 + $0x550] sm:$0xf0]  ;;  %v4473_v37 = vld [vmem:[#allocation2 + $0x224] sm:$0xf]  ;;  %v3528_v40 = vor.u32 %v4541_v29, %v3525_v30  ;;  %v3467_v24 = vld [vmem:[#allocation2 + $0x3c8] sm:$0xf] }
  0x57   :  { %1404 = vmatmul.bf16.vlgmr.msra.gmra.mxu2 %v4915_v9  ;;  %v3253_v38 = vld [vmem:[#allocation2 + $0x230] sm:$0xf0]  ;;  %v4505_v41 = vld [vmem:[#allocation2 + $0x324] sm:$0xf]  ;;  %v3656_v45 = vor.u32 %v4573_v32, %v3653_v36  ;;  %v3211_v27 = vld [vmem:[#allocation2 + $0x1c8] sm:$0xf] }
  0x58   :  { %1448 = vmatpush.bf16.msrb.mxu2 %v3736_v42  ;;  %1436 = vmatpush.bf16.msra.mxu3 %v3592_v49  ;;  %v3381_v42 = vld [vmem:[#allocation2 + $0x330] sm:$0xf0]  ;;  %v4537_v43 = vld [vmem:[#allocation2 + $0x424] sm:$0xf]  ;;  %v3256_v49 = vor.u32 %v4473_v37, %v3253_v38  ;;  %v4464_v28 = vld [vmem:[#allocation2 + $0x1d4] sm:$0xf0] }
  0x59   :  { %v3509_v44 = vld [vmem:[#allocation2 + $0x430] sm:$0xf0]  ;;  %v4569_v46 = vld [vmem:[#allocation2 + $0x524] sm:$0xf]  ;;  %v3384_v50 = vor.u32 %v4505_v41, %v3381_v42  ;;  %v3067_v30 = vld [vmem:[#allocation2 + $0xa8] sm:$0xf]  ;;  %v3212_v36 = vor.u32 %v4464_v28, %v3211_v27 }
  0x5a   :  { %1411 = vmatpush.bf16.msra.mxu0 %v3320_v58  ;;  %1424 = vmatpush.bf16.msra.mxu1 %v3448_v59  ;;  %v3637_v47 = vld [vmem:[#allocation2 + $0x530] sm:$0xf0]  ;;  %v4469_v51 = vld [vmem:[#allocation2 + $0x204] sm:$0xf]  ;;  %v3512_v55 = vor.u32 %v4537_v43, %v3509_v44  ;;  %v3451_v37 = vld [vmem:[#allocation2 + $0x3a8] sm:$0xf] }
  0x5b   :  { %v3237_v52 = vld [vmem:[#allocation2 + $0x210] sm:$0xf0]  ;;  %v4501_v54 = vld [vmem:[#allocation2 + $0x304] sm:$0xf]  ;;  %v4524_v38 = vld [vmem:[#allocation2 + $0x3b4] sm:$0xf0] }
  0x5c   :  { %1449 = vmatpush.bf16.msrb.mxu2 %v3720_v56  ;;  %1437 = vmatpush.bf16.msra.mxu3 %v3576_v0  ;;  %v3365_v56 = vld [vmem:[#allocation2 + $0x310] sm:$0xf0]  ;;  %v4533_v58 = vld [vmem:[#allocation2 + $0x404] sm:$0xf]  ;;  %v3640_v0 = vor.u32 %v4569_v46, %v3637_v47  ;;  %v3240_v4 = vor.u32 %v4469_v51, %v3237_v52  ;;  %v3195_v41 = vld [vmem:[#allocation2 + $0x1a8] sm:$0xf]  ;;  %v3452_v46 = vor.u32 %v4524_v38, %v3451_v37 }
  0x5d   :  { %v3493_v59 = vld [vmem:[#allocation2 + $0x410] sm:$0xf0]  ;;  %v4597_v63 = vld [vmem:[#allocation2 + $0x604] sm:$0xf]  ;;  %v3368_v5 = vor.u32 %v4501_v54, %v3365_v56  ;;  %v4460_v42 = vld [vmem:[#allocation2 + $0x1b4] sm:$0xf0] }
  0x5e   :  { %1412 = vmatpush.bf16.msra.mxu0 %v3304_v7  ;;  %1425 = vmatpush.bf16.msra.mxu1 %v3432_v8  ;;  %v3749_v1 = vld [vmem:[#allocation2 + $0x610] sm:$0xf0]  ;;  %v3496_v8 = vor.u32 %v4533_v58, %v3493_v59  ;;  %v3051_v44 = vld [vmem:[#allocation2 + $0x88] sm:$0xf]  ;;  %v4520_v52 = vld [vmem:[#allocation2 + $0x394] sm:$0xf0] }
  0x5f   :  { %v3621_v7 = vld [vmem:[#allocation2 + $0x510] sm:$0xf0]  ;;  %v3307_v47 = vld [vmem:[#allocation2 + $0x288] sm:$0xf]  ;;  %v4456_v56 = vld [vmem:[#allocation2 + $0x194] sm:$0xf0] }
  0x60   :  { %1450 = vmatpush.bf16.msrb.mxu2 %v3704_v6  ;;  %1438 = vmatpush.bf16.msra.mxu3 %v3560_v13  ;;  %v4565_v6 = vld [vmem:[#allocation2 + $0x504] sm:$0xf]  ;;  %v3752_v13 = vor.u32 %v4597_v63, %v3749_v1  ;;  %v3435_v51 = vld [vmem:[#allocation2 + $0x388] sm:$0xf]  ;;  %v4420_v61 = vld [vmem:[#allocation2 + $0x74] sm:$0xf0] }
  0x61   :  { %v3624_v17 = vor.u32 %v4565_v6, %v3621_v7  ;;  %v3035_v59 = vld [vmem:[#allocation2 + $0x68] sm:$0xf]  ;;  %v3436_v62 = vor.u32 %v4520_v52, %v3435_v51  ;;  %v4516_v3 = vld [vmem:[#allocation2 + $0x374] sm:$0xf0]  ;;  %v4434_v51 = vld [vmem:[#allocation2 + $0xec] sm:$0xf] }
  0x62   :  { %1413 = vmatpush.bf16.msra.mxu0 %v3288_v20  ;;  %1426 = vmatpush.bf16.msra.mxu1 %v3416_v21  ;;  %v3484_v20 = vor.u32 %v4532_v12, %v3483_v11  ;;  %v3339_v21 = vld [vmem:[#allocation2 + $0x2c8] sm:$0xf]  ;;  %v4452_v6 = vld [vmem:[#allocation2 + $0x174] sm:$0xf0]  ;;  %v3101_v52 = vld [vmem:[#allocation2 + $0xf8] sm:$0xf0] }
  0x63   :  { %v3340_v29 = vor.u32 %v4496_v22, %v3339_v21  ;;  %v3291_v63 = vld [vmem:[#allocation2 + $0x268] sm:$0xf]  ;;  %v4412_v22 = vld [vmem:[#allocation2 + $0x34] sm:$0xf0] }
  0x64   :  { %1451 = vmatpush.bf16.msrb.mxu2 %v3688_v19  ;;  %1439 = vmatpush.bf16.msra.mxu3 %v3544_v25  ;;  %v4432_v19 = vld [vmem:[#allocation2 + $0xd4] sm:$0xf0]  ;;  %v3419_v2 = vld [vmem:[#allocation2 + $0x368] sm:$0xf] }
  0x65   :  { %v4528_v25 = vld [vmem:[#allocation2 + $0x3d4] sm:$0xf0]  ;;  %v3084_v26 = vor.u32 %v4432_v19, %v3083_v18  ;;  %v3420_v11 = vor.u32 %v4516_v3, %v3419_v2  ;;  %v3275_v12 = vld [vmem:[#allocation2 + $0x248] sm:$0xf]  ;;  %v3104_v3 = vor.u32 %v4434_v51, %v3101_v52 }
  0x66   :  { %1414 = vmatpush.bf16.msra.mxu0 %v3272_v33  ;;  %1427 = vmatpush.bf16.msra.mxu1 %v3400_v35  ;;  %v3468_v32 = vor.u32 %v4528_v25, %v3467_v24  ;;  %v3323_v33 = vld [vmem:[#allocation2 + $0x2a8] sm:$0xf]  ;;  %v4492_v35 = vld [vmem:[#allocation2 + $0x2b4] sm:$0xf0] }
  0x67   :  { %v3324_v43 = vor.u32 %v4492_v35, %v3323_v33  ;;  %v3403_v15 = vld [vmem:[#allocation2 + $0x348] sm:$0xf]  ;;  %v4448_v19 = vld [vmem:[#allocation2 + $0x154] sm:$0xf0] }
  0x68   :  { %1452 = vmatpush.bf16.msrb.mxu2 %v3672_v31  ;;  %1440 = vmatpush.bf16.msra.mxu3 %v3528_v40  ;;  %v4428_v31 = vld [vmem:[#allocation2 + $0xb4] sm:$0xf0]  ;;  %v3147_v18 = vld [vmem:[#allocation2 + $0x148] sm:$0xf] }
  0x69   :  { %v3068_v40 = vor.u32 %v4428_v31, %v3067_v30  ;;  %v3003_v21 = vld [vmem:[#allocation2 + $0x28] sm:$0xf]  ;;  %v4476_v25 = vld [vmem:[#allocation2 + $0x234] sm:$0xf0] }
  0x6a   :  { %1415 = vmatpush.bf16.msra.mxu0 %v3256_v49  ;;  %1428 = vmatpush.bf16.msra.mxu1 %v3384_v50  ;;  %v4488_v49 = vld [vmem:[#allocation2 + $0x294] sm:$0xf0]  ;;  %v3196_v50 = vor.u32 %v4460_v42, %v3195_v41  ;;  %v3259_v24 = vld [vmem:[#allocation2 + $0x228] sm:$0xf] }
  0x6b   :  { %v3308_v58 = vor.u32 %v4488_v49, %v3307_v47  ;;  %v3387_v27 = vld [vmem:[#allocation2 + $0x328] sm:$0xf]  ;;  %v4508_v28 = vld [vmem:[#allocation2 + $0x334] sm:$0xf0]  ;;  %v3260_v33 = vor.u32 %v4476_v25, %v3259_v24 }
  0x6c   :  { %1453 = vmatpush.bf16.msrb.mxu2 %v3656_v45  ;;  %1441 = vmatpush.bf16.msra.mxu3 %v3512_v55  ;;  %v4424_v45 = vld [vmem:[#allocation2 + $0x94] sm:$0xf0]  ;;  %v3179_v55 = vld [vmem:[#allocation2 + $0x188] sm:$0xf]  ;;  %v3388_v38 = vor.u32 %v4508_v28, %v3387_v27  ;;  %v3197_v27 = vld [vmem:[#allocation2 + $0x1b8] sm:$0xf0] }
  0x6d   :  { %v3052_v54 = vor.u32 %v4424_v45, %v3051_v44  ;;  %v3180_v1 = vor.u32 %v4456_v56, %v3179_v55  ;;  %v3131_v30 = vld [vmem:[#allocation2 + $0x128] sm:$0xf]  ;;  %v4444_v31 = vld [vmem:[#allocation2 + $0x134] sm:$0xf0] }
  0x6e   :  { %1416 = vmatpush.bf16.msra.mxu0 %v3240_v4  ;;  %1429 = vmatpush.bf16.msra.mxu1 %v3368_v5  ;;  %v3036_v4 = vor.u32 %v4420_v61, %v3035_v59  ;;  %v3163_v5 = vld [vmem:[#allocation2 + $0x168] sm:$0xf]  ;;  %v4408_v35 = vld [vmem:[#allocation2 + $0x14] sm:$0xf0]  ;;  %v3132_v44 = vor.u32 %v4444_v31, %v3131_v30  ;;  %v4422_v30 = vld [vmem:[#allocation2 + $0x8c] sm:$0xf] }
  0x6f   :  { %v3164_v14 = vor.u32 %v4452_v6, %v3163_v5  ;;  %v4564_v37 = vld [vmem:[#allocation2 + $0x4f4] sm:$0xf0]  ;;  %v3243_v41 = vld [vmem:[#allocation2 + $0x208] sm:$0xf]  ;;  %v4430_v5 = vld [vmem:[#allocation2 + $0xcc] sm:$0xf] }
  0x70   :  { %1454 = vmatpush.bf16.msrb.mxu2 %v3640_v0  ;;  %1442 = vmatpush.bf16.msra.mxu3 %v3496_v8  ;;  %v4484_v0 = vld [vmem:[#allocation2 + $0x274] sm:$0xf0]  ;;  %v3019_v8 = vld [vmem:[#allocation2 + $0x48] sm:$0xf]  ;;  %v3085_v6 = vld [vmem:[#allocation2 + $0xd8] sm:$0xf0] }
  0x71   :  { %1417 = vmatmul.bf16.vlgmr.msra.gmra.mxu0 %v4907_v53  ;;  %1430 = vmatmul.bf16.vlgmr.msra.gmra.mxu1 %v4911_v60  ;;  %v3292_v7 = vor.u32 %v4484_v0, %v3291_v63  ;;  %v4472_v42 = vld [vmem:[#allocation2 + $0x214] sm:$0xf0]  ;;  %v3739_v56 = vld [vmem:[#allocation2 + $0x5e8] sm:$0xf]  ;;  %v4466_v0 = vld [vmem:[#allocation2 + $0x1ec] sm:$0xf] }
  0x72   :  { %1474 = vmatpush.bf16.msrb.mxu1 %v3100_v10  ;;  %1500 = vmatpush.bf16.msrb.mxu0 %v3356_v16  ;;  %v4416_v10 = vld [vmem:[#allocation2 + $0x54] sm:$0xf0]  ;;  %v3244_v55 = vor.u32 %v4472_v42, %v3243_v41  ;;  %v3595_v59 = vld [vmem:[#allocation2 + $0x4c8] sm:$0xf]  ;;  %v3053_v31 = vld [vmem:[#allocation2 + $0x98] sm:$0xf0] }
  0x73   :  { %1443 = vmatmul.bf16.vlgmr.msra.gmra.mxu3 %v4929_v34  ;;  %v4512_v16 = vld [vmem:[#allocation2 + $0x354] sm:$0xf0]  ;;  %v3563_v24 = vld [vmem:[#allocation2 + $0x488] sm:$0xf]  ;;  %v3181_v41 = vld [vmem:[#allocation2 + $0x198] sm:$0xf0]  ;;  %v3056_v42 = vor.u32 %v4422_v30, %v3053_v31 }
  0x74   :  { %1468 = vmatpush.bf16.msrb.mxu3 %v3752_v13  ;;  %1455 = vmatpush.bf16.msrb.mxu2 %v3624_v17  ;;  %v4480_v13 = vld [vmem:[#allocation2 + $0x254] sm:$0xf0]  ;;  %v3020_v17 = vor.u32 %v4416_v10, %v3019_v8  ;;  %v3723_v10 = vld [vmem:[#allocation2 + $0x5c8] sm:$0xf]  ;;  %v3485_v30 = vld [vmem:[#allocation2 + $0x3f8] sm:$0xf0] }
  0x75   :  { %v4504_v45 = vld [vmem:[#allocation2 + $0x314] sm:$0xf0]  ;;  %v3531_v51 = vld [vmem:[#allocation2 + $0x448] sm:$0xf] }
  0x76   :  { %1475 = vmatpush.bf16.msrb.mxu1 %v3084_v26  ;;  %1501 = vmatpush.bf16.msrb.mxu0 %v3340_v29  ;;  %v3148_v26 = vor.u32 %v4448_v19, %v3147_v18  ;;  %v3004_v29 = vor.u32 %v4412_v22, %v3003_v21  ;;  %v4600_v47 = vld [vmem:[#allocation2 + $0x614] sm:$0xf0]  ;;  %v4426_v18 = vld [vmem:[#allocation2 + $0xac] sm:$0xf]  ;;  %v3069_v19 = vld [vmem:[#allocation2 + $0xb8] sm:$0xf0] }
  0x77   :  { %1456 = vmatmul.bf16.vlgmr.msrb.gmra.mxu2 %v4931_v39  ;;  %v3707_v22 = vld [vmem:[#allocation2 + $0x5a8] sm:$0xf]  ;;  %v4552_v25 = vld [vmem:[#allocation2 + $0x494] sm:$0xf0]  ;;  %v3072_v28 = vor.u32 %v4426_v18, %v3069_v19  ;;  %v3133_v18 = vld [vmem:[#allocation2 + $0x138] sm:$0xf0] }
  0x78   :  { %1513 = vmatpush.bf16.msra.mxu2 %v3484_v20  ;;  %1487 = vmatpush.bf16.msra.mxu3 %v3228_v23  ;;  %v3276_v20 = vor.u32 %v4480_v13, %v3275_v12  ;;  %v3404_v23 = vor.u32 %v4512_v16, %v3403_v15  ;;  %v3579_v12 = vld [vmem:[#allocation2 + $0x4a8] sm:$0xf]  ;;  %v4556_v13 = vld [vmem:[#allocation2 + $0x4b4] sm:$0xf0]  ;;  %v3213_v15 = vld [vmem:[#allocation2 + $0x1d8] sm:$0xf0]  ;;  %v3088_v16 = vor.u32 %v4430_v5, %v3085_v6 }
  0x79   :  { %v4544_v52 = vld [vmem:[#allocation2 + $0x454] sm:$0xf0]  ;;  %v3149_v5 = vld [vmem:[#allocation2 + $0x158] sm:$0xf0] }
  0x7a   :  { %1476 = vmatpush.bf16.msrb.mxu1 %v3068_v40  ;;  %1502 = vmatpush.bf16.msrb.mxu0 %v3324_v43  ;;  %v3115_v40 = vld [vmem:[#allocation2 + $0x108] sm:$0xf] }
  0x7b   :  { %v3371_v43 = vld [vmem:[#allocation2 + $0x308] sm:$0xf] }
  0x7c   :  { %1514 = vmatpush.bf16.msra.mxu2 %v3468_v32  ;;  %1488 = vmatpush.bf16.msra.mxu3 %v3212_v36  ;;  %v2987_v32 = vld [vmem:[#allocation2 + $0x8] sm:$0xf]  ;;  %v3372_v61 = vor.u32 %v4504_v45, %v3371_v43  ;;  %v3037_v45 = vld [vmem:[#allocation2 + $0x78] sm:$0xf0] }
  0x7d   :  { %v3611_v36 = vld [vmem:[#allocation2 + $0x4e8] sm:$0xf]  ;;  %v2988_v49 = vor.u32 %v4408_v35, %v2987_v32  ;;  %v3564_v32 = vor.u32 %v4552_v25, %v3563_v24  ;;  %v4406_v24 = vld [vmem:[#allocation2 + $0xc] sm:$0xf]  ;;  %v2989_v25 = vld [vmem:[#allocation2 + $0x18] sm:$0xf0] }
  0x7e   :  { %1477 = vmatpush.bf16.msrb.mxu1 %v3052_v54  ;;  %1503 = vmatpush.bf16.msrb.mxu0 %v3308_v58  ;;  %v3612_v54 = vor.u32 %v4564_v37, %v3611_v36  ;;  %v4596_v58 = vld [vmem:[#allocation2 + $0x5f4] sm:$0xf0]  ;;  %v3691_v35 = vld [vmem:[#allocation2 + $0x588] sm:$0xf] }
  0x7f   :  { %v4584_v36 = vld [vmem:[#allocation2 + $0x594] sm:$0xf0]  ;;  %v3547_v37 = vld [vmem:[#allocation2 + $0x468] sm:$0xf] }
  0x80   :  { %1515 = vmatpush.bf16.msra.mxu2 %v3452_v46  ;;  %1489 = vmatpush.bf16.msra.mxu3 %v3196_v50  ;;  %v3755_v46 = vld [vmem:[#allocation2 + $0x608] sm:$0xf]  ;;  %v4440_v50 = vld [vmem:[#allocation2 + $0x114] sm:$0xf0]  ;;  %v3692_v43 = vor.u32 %v4584_v36, %v3691_v35  ;;  %v4494_v35 = vld [vmem:[#allocation2 + $0x2cc] sm:$0xf]  ;;  %v2992_v36 = vor.u32 %v4406_v24, %v2989_v25 }
  0x81   :  { %v3756_v63 = vor.u32 %v4600_v47, %v3755_v46  ;;  %v3116_v2 = vor.u32 %v4440_v50, %v3115_v40  ;;  %v4454_v40 = vld [vmem:[#allocation2 + $0x18c] sm:$0xf]  ;;  %v4580_v50 = vld [vmem:[#allocation2 + $0x574] sm:$0xf0] }
  0x82   :  { %1478 = vmatpush.bf16.msrb.mxu1 %v3036_v4  ;;  %1504 = vmatpush.bf16.msrb.mxu0 %v3292_v7  ;;  %v3740_v4 = vor.u32 %v4596_v58, %v3739_v56  ;;  %v3184_v47 = vor.u32 %v4454_v40, %v3181_v41  ;;  %v3117_v40 = vld [vmem:[#allocation2 + $0x118] sm:$0xf0]  ;;  %v4514_v24 = vld [vmem:[#allocation2 + $0x36c] sm:$0xf] }
  0x83   :  { %3762 = vmatmul.msk.bf16.vlgmr.msrb.gmra.mxu3 %vm1288_vm0, %v4922_v48 }
  0x84   :  { %1516 = vmatpush.bf16.msra.mxu2 %v3436_v62  ;;  %1490 = vmatpush.bf16.msra.mxu3 %v3180_v1  ;;  %v4560_v62 = vld [vmem:[#allocation2 + $0x4d4] sm:$0xf0]  ;;  %v3229_v1 = vld [vmem:[#allocation2 + $0x1f8] sm:$0xf0] }
  0x85   :  { %v3596_v7 = vor.u32 %v4560_v62, %v3595_v59  ;;  %v3232_v8 = vor.u32 %v4466_v0, %v3229_v1  ;;  %v4414_v59 = vld [vmem:[#allocation2 + $0x4c] sm:$0xf]  ;;  %v3532_v62 = vor.u32 %v4544_v52, %v3531_v51  ;;  %v3659_v0 = vld [vmem:[#allocation2 + $0x548] sm:$0xf]  ;;  %v4576_v1 = vld [vmem:[#allocation2 + $0x554] sm:$0xf0] }
  0x86   :  { %1479 = vmatpush.bf16.msrb.mxu1 %v3020_v17  ;;  %1505 = vmatpush.bf16.msrb.mxu0 %v3276_v20  ;;  %v3580_v20 = vor.u32 %v4556_v13, %v3579_v12  ;;  %v3643_v13 = vld [vmem:[#allocation2 + $0x528] sm:$0xf]  ;;  %v4558_v51 = vld [vmem:[#allocation2 + $0x4cc] sm:$0xf]  ;;  %v3597_v52 = vld [vmem:[#allocation2 + $0x4d8] sm:$0xf0] }
  0x88   :  { %1517 = vmatpush.bf16.msra.mxu2 %v3420_v11  ;;  %1491 = vmatpush.bf16.msra.mxu3 %v3164_v14  ;;  %v4592_v11 = vld [vmem:[#allocation2 + $0x5d4] sm:$0xf0]  ;;  %v4462_v14 = vld [vmem:[#allocation2 + $0x1cc] sm:$0xf] }
  0x89   :  { %v3724_v17 = vor.u32 %v4592_v11, %v3723_v10  ;;  %v3216_v21 = vor.u32 %v4462_v14, %v3213_v15  ;;  %v3005_v10 = vld [vmem:[#allocation2 + $0x38] sm:$0xf0]  ;;  %v4572_v14 = vld [vmem:[#allocation2 + $0x534] sm:$0xf0]  ;;  %v3499_v15 = vld [vmem:[#allocation2 + $0x408] sm:$0xf] }
  0x8a   :  { %1480 = vmatpush.bf16.msrb.mxu1 %v3004_v29  ;;  %1506 = vmatpush.bf16.msrb.mxu0 %v3260_v33 }
  0x8c   :  { %1518 = vmatpush.bf16.msra.mxu2 %v3404_v23  ;;  %1492 = vmatpush.bf16.msra.mxu3 %v3148_v26  ;;  %v4588_v23 = vld [vmem:[#allocation2 + $0x5b4] sm:$0xf0]  ;;  %v4458_v26 = vld [vmem:[#allocation2 + $0x1ac] sm:$0xf] }
  0x8d   :  { %v3708_v29 = vor.u32 %v4588_v23, %v3707_v22  ;;  %v3200_v33 = vor.u32 %v4458_v26, %v3197_v27  ;;  %v3644_v22 = vor.u32 %v4572_v14, %v3643_v13  ;;  %v3627_v23 = vld [vmem:[#allocation2 + $0x508] sm:$0xf]  ;;  %v3437_v14 = vld [vmem:[#allocation2 + $0x398] sm:$0xf0] }
  0x8e   :  { %1481 = vmatpush.bf16.msrb.mxu1 %v2988_v49  ;;  %1507 = vmatpush.bf16.msrb.mxu0 %v3244_v55  ;;  %v3675_v49 = vld [vmem:[#allocation2 + $0x568] sm:$0xf]  ;;  %v3165_v55 = vld [vmem:[#allocation2 + $0x178] sm:$0xf0] }
  0x8f   :  { %v3676_v58 = vor.u32 %v4580_v50, %v3675_v49  ;;  %v3469_v50 = vld [vmem:[#allocation2 + $0x3d8] sm:$0xf0] }
  0x90   :  { %1519 = vmatpush.bf16.msra.mxu2 %v3388_v38  ;;  %1493 = vmatpush.bf16.msra.mxu3 %v3132_v44  ;;  %v4548_v38 = vld [vmem:[#allocation2 + $0x474] sm:$0xf0]  ;;  %v4418_v44 = vld [vmem:[#allocation2 + $0x6c] sm:$0xf] }
  0x91   :  { %1508 = vmatmul.bf16.vlgmr.msrb.gmra.mxu0 %v4907_v53  ;;  %1482 = vmatmul.bf16.vlgmr.msrb.gmra.mxu1 %v4909_v57  ;;  %v3548_v46 = vor.u32 %v4548_v38, %v3547_v37  ;;  %v3040_v56 = vor.u32 %v4418_v44, %v3037_v45  ;;  %v3341_v37 = vld [vmem:[#allocation2 + $0x2d8] sm:$0xf0]  ;;  %v4438_v38 = vld [vmem:[#allocation2 + $0x10c] sm:$0xf] }
  0x92   :  { %1526 = vmatpush.bf16.msra.mxu1 %v3612_v54  ;;  %1559 = vmatpush.bf16.msra.mxu0 %v3756_v63  ;;  %v4450_v54 = vld [vmem:[#allocation2 + $0x16c] sm:$0xf]  ;;  %v3120_v49 = vor.u32 %v4438_v38, %v3117_v40 }
  0x93   :  { %v3168_v63 = vor.u32 %v4450_v54, %v3165_v55  ;;  %v4490_v55 = vld [vmem:[#allocation2 + $0x2ac] sm:$0xf] }
  0x94   :  { %1520 = vmatpush.bf16.msra.mxu2 %v3372_v61  ;;  %1494 = vmatpush.bf16.msra.mxu3 %v3116_v2  ;;  %v3021_v61 = vld [vmem:[#allocation2 + $0x58] sm:$0xf0]  ;;  %v3515_v2 = vld [vmem:[#allocation2 + $0x428] sm:$0xf]  ;;  %v4510_v38 = vld [vmem:[#allocation2 + $0x34c] sm:$0xf] }
  0x95   :  { %v3024_v6 = vor.u32 %v4414_v59, %v3021_v61  ;;  %v3725_v59 = vld [vmem:[#allocation2 + $0x5d8] sm:$0xf0] }
  0x96   :  { %1527 = vmatpush.bf16.msra.mxu1 %v3596_v7  ;;  %1578 = vmatpush.bf16.msrb.mxu0 %v3232_v8  ;;  %v3660_v7 = vor.u32 %v4576_v1, %v3659_v0  ;;  %v4410_v8 = vld [vmem:[#allocation2 + $0x2c] sm:$0xf]  ;;  %v3453_v1 = vld [vmem:[#allocation2 + $0x3b8] sm:$0xf0] }
  0x97   :  { %1495 = vmatmul.bf16.vlgmr.msra.gmra.mxu3 %v4915_v9  ;;  %1521 = vmatmul.bf16.vlgmr.msra.gmra.mxu2 %v4911_v60  ;;  %v3008_v19 = vor.u32 %v4410_v8, %v3005_v10  ;;  %v3709_v8 = vld [vmem:[#allocation2 + $0x5b8] sm:$0xf0] }
  0x98   :  { %1565 = vmatpush.bf16.msrb.mxu2 %v3104_v3  ;;  %1539 = vmatpush.bf16.msrb.mxu3 %v3740_v4  ;;  %v4540_v3 = vld [vmem:[#allocation2 + $0x434] sm:$0xf0]  ;;  %v4446_v4 = vld [vmem:[#allocation2 + $0x14c] sm:$0xf] }
  0x99   :  { %v3516_v11 = vor.u32 %v4540_v3, %v3515_v2  ;;  %v3152_v12 = vor.u32 %v4446_v4, %v3149_v5  ;;  %v4554_v2 = vld [vmem:[#allocation2 + $0x4ac] sm:$0xf]  ;;  %v3581_v3 = vld [vmem:[#allocation2 + $0x4b8] sm:$0xf0] }
  0x9a   :  { %1528 = vmatpush.bf16.msra.mxu1 %v3580_v20  ;;  %1579 = vmatpush.bf16.msrb.mxu0 %v3216_v21  ;;  %v4498_v20 = vld [vmem:[#allocation2 + $0x2ec] sm:$0xf]  ;;  %v3357_v21 = vld [vmem:[#allocation2 + $0x2f8] sm:$0xf0] }
  0x9b   :  { %v3360_v31 = vor.u32 %v4498_v20, %v3357_v21  ;;  %v4486_v5 = vld [vmem:[#allocation2 + $0x28c] sm:$0xf]  ;;  %v3693_v21 = vld [vmem:[#allocation2 + $0x598] sm:$0xf0] }
  0x9c   :  { %1566 = vmatpush.bf16.msrb.mxu2 %v3088_v16  ;;  %1540 = vmatpush.bf16.msrb.mxu3 %v3724_v17  ;;  %v4536_v16 = vld [vmem:[#allocation2 + $0x414] sm:$0xf0]  ;;  %v4442_v17 = vld [vmem:[#allocation2 + $0x12c] sm:$0xf] }
  0x9d   :  { %v3500_v26 = vor.u32 %v4536_v16, %v3499_v15  ;;  %v3136_v27 = vor.u32 %v4442_v17, %v3133_v18  ;;  %v4550_v15 = vld [vmem:[#allocation2 + $0x48c] sm:$0xf]  ;;  %v3565_v16 = vld [vmem:[#allocation2 + $0x498] sm:$0xf0] }
  0x9e   :  { %1529 = vmatpush.bf16.msra.mxu1 %v3564_v32  ;;  %1580 = vmatpush.bf16.msrb.mxu0 %v3200_v33  ;;  %v4562_v32 = vld [vmem:[#allocation2 + $0x4ec] sm:$0xf]  ;;  %v3613_v33 = vld [vmem:[#allocation2 + $0x4f8] sm:$0xf0] }
  0x9f   :  { %v3616_v45 = vor.u32 %v4562_v32, %v3613_v33  ;;  %v4482_v18 = vld [vmem:[#allocation2 + $0x26c] sm:$0xf]  ;;  %v3677_v33 = vld [vmem:[#allocation2 + $0x578] sm:$0xf0] }
  0xa0   :  { %1567 = vmatpush.bf16.msrb.mxu2 %v3072_v28  ;;  %1541 = vmatpush.bf16.msrb.mxu3 %v3708_v29  ;;  %v4568_v28 = vld [vmem:[#allocation2 + $0x514] sm:$0xf0]  ;;  %v4530_v29 = vld [vmem:[#allocation2 + $0x3ec] sm:$0xf] }
  0xa1   :  { %3763 = vmatmul.msk.bf16.vlgmr.msra.gmra.mxu0 %vm1288_vm0, %v4922_v48  ;;  %v3628_v41 = vor.u32 %v4568_v28, %v3627_v23  ;;  %v3488_v44 = vor.u32 %v4530_v29, %v3485_v30  ;;  %v3568_v23 = vor.u32 %v4550_v15, %v3565_v16  ;;  %v3549_v28 = vld [vmem:[#allocation2 + $0x478] sm:$0xf0]  ;;  %v4478_v30 = vld [vmem:[#allocation2 + $0x24c] sm:$0xf] }
  0xa2   :  { %1530 = vmatpush.bf16.msra.mxu1 %v3548_v46  ;;  %1581 = vmatpush.bf16.msrb.mxu0 %v3184_v47  ;;  %v4526_v46 = vld [vmem:[#allocation2 + $0x3cc] sm:$0xf]  ;;  %v3344_v47 = vor.u32 %v4494_v35, %v3341_v37  ;;  %v3501_v15 = vld [vmem:[#allocation2 + $0x418] sm:$0xf0] }
  0xa3   :  { %v3472_v61 = vor.u32 %v4526_v46, %v3469_v50  ;;  %v4578_v32 = vld [vmem:[#allocation2 + $0x56c] sm:$0xf] }
  0xa4   :  { %1568 = vmatpush.bf16.msrb.mxu2 %v3056_v42  ;;  %1542 = vmatpush.bf16.msrb.mxu3 %v3692_v43  ;;  %v4594_v42 = vld [vmem:[#allocation2 + $0x5ec] sm:$0xf]  ;;  %v3741_v43 = vld [vmem:[#allocation2 + $0x5f8] sm:$0xf0] }
  0xa5   :  { %v3744_v54 = vor.u32 %v4594_v42, %v3741_v43  ;;  %v3405_v42 = vld [vmem:[#allocation2 + $0x358] sm:$0xf0]  ;;  %v4542_v43 = vld [vmem:[#allocation2 + $0x44c] sm:$0xf] }
  0xa6   :  { %1531 = vmatpush.bf16.msra.mxu1 %v3532_v62  ;;  %1582 = vmatpush.bf16.msrb.mxu0 %v3168_v63  ;;  %v3600_v62 = vor.u32 %v4558_v51, %v3597_v52  ;;  %v4522_v63 = vld [vmem:[#allocation2 + $0x3ac] sm:$0xf]  ;;  %v3661_v51 = vld [vmem:[#allocation2 + $0x558] sm:$0xf0]  ;;  %v3408_v52 = vor.u32 %v4510_v38, %v3405_v42  ;;  %v3847_v42 = vld [vmem:[#allocation4 + $0xa0] sm:$0xf] }
  0xa7   :  { %v3456_v10 = vor.u32 %v4522_v63, %v3453_v1  ;;  %v4474_v46 = vld [vmem:[#allocation2 + $0x22c] sm:$0xf] }
  0xa8   :  { %1569 = vmatpush.bf16.msrb.mxu2 %v3040_v56  ;;  %1543 = vmatpush.bf16.msrb.mxu3 %v3676_v58  ;;  %v3325_v56 = vld [vmem:[#allocation2 + $0x2b8] sm:$0xf0]  ;;  %v4590_v58 = vld [vmem:[#allocation2 + $0x5cc] sm:$0xf] }
  0xa9   :  { %v3328_v0 = vor.u32 %v4490_v55, %v3325_v56  ;;  %v3728_v4 = vor.u32 %v4590_v58, %v3725_v59  ;;  %v4574_v50 = vld [vmem:[#allocation2 + $0x54c] sm:$0xf]  ;;  %v3389_v58 = vld [vmem:[#allocation2 + $0x338] sm:$0xf0] }
  0xaa   :  { %1532 = vmatpush.bf16.msra.mxu1 %v3516_v11  ;;  %1583 = vmatpush.bf16.msrb.mxu0 %v3152_v12  ;;  %v3584_v11 = vor.u32 %v4554_v2, %v3581_v3  ;;  %v4518_v12 = vld [vmem:[#allocation2 + $0x38c] sm:$0xf]  ;;  %v3645_v3 = vld [vmem:[#allocation2 + $0x538] sm:$0xf0] }
  0xab   :  { %v4506_v55 = vld [vmem:[#allocation2 + $0x32c] sm:$0xf] }
  0xac   :  { %1570 = vmatpush.bf16.msrb.mxu2 %v3024_v6  ;;  %1544 = vmatpush.bf16.msrb.mxu3 %v3660_v7  ;;  %v3309_v6 = vld [vmem:[#allocation2 + $0x298] sm:$0xf0]  ;;  %v4586_v7 = vld [vmem:[#allocation2 + $0x5ac] sm:$0xf] }
  0xad   :  { %v3312_v13 = vor.u32 %v4486_v5, %v3309_v6  ;;  %v3712_v17 = vor.u32 %v4586_v7, %v3709_v8  ;;  %v4538_v59 = vld [vmem:[#allocation2 + $0x42c] sm:$0xf]  ;;  %v3757_v5 = vld [vmem:[#allocation2 + $0x618] sm:$0xf0]  ;;  %v4964_v6 = vld [vmem:[%s5060_s2] sm:$0xf]  ;;  %v3392_v8 = vor.u32 %v4506_v55, %v3389_v58 }
  0xae   :  { %1533 = vmatpush.bf16.msra.mxu1 %v3500_v26  ;;  %1584 = vmatpush.bf16.msrb.mxu0 %v3136_v27  ;;  %v3421_v26 = vld [vmem:[#allocation2 + $0x378] sm:$0xf0]  ;;  %v4546_v27 = vld [vmem:[#allocation2 + $0x46c] sm:$0xf] }
  0xaf   :  { %v3552_v37 = vor.u32 %v4546_v27, %v3549_v28  ;;  %v4470_v63 = vld [vmem:[#allocation2 + $0x20c] sm:$0xf] }
  0xb0   :  { %1571 = vmatpush.bf16.msrb.mxu2 %v3008_v19  ;;  %1545 = vmatpush.bf16.msrb.mxu3 %v3644_v22  ;;  %v3293_v19 = vld [vmem:[#allocation2 + $0x278] sm:$0xf0]  ;;  %v3440_v22 = vor.u32 %v4518_v12, %v3437_v14  ;;  %v4570_v1 = vld [vmem:[#allocation2 + $0x52c] sm:$0xf] }
  0xb1   :  { %1534 = vmatmul.bf16.vlgmr.msra.gmra.mxu1 %v4929_v34  ;;  %v3296_v25 = vor.u32 %v4482_v18, %v3293_v19  ;;  %v4534_v14 = vld [vmem:[#allocation2 + $0x40c] sm:$0xf]  ;;  %v3879_v18 = vld [vmem:[#allocation4 + $0xe0] sm:$0xf]  ;;  %v4631_v19 = vld [vmem:[#allocation4 + $0xec] sm:$0xf0] }
  0xb2   :  { %1591 = vmatpush.bf16.msrb.mxu1 %v3360_v31  ;;  %1585 = vmatpush.bf16.msrb.mxu0 %v3120_v49  ;;  %v4953_v20 = vpop.f32.mrf.mxu0  ;;  %v4955_v29 = vpop.f32.mrf.mxu1  ;;  %v3277_v31 = vld [vmem:[#allocation2 + $0x258] sm:$0xf0]  ;;  %v3504_v27 = vor.u32 %v4534_v14, %v3501_v15  ;;  %v3880_v28 = vor.u32 %v4631_v19, %v3879_v18  ;;  %v3911_v15 = vld [vmem:[#allocation4 + $0x120] sm:$0xf]  ;;  %v4603_v19 = vld [vmem:[#allocation4 + $0xc] sm:$0xf0] }
  0xb3   :  { %v3280_v40 = vor.u32 %v4478_v30, %v3277_v31  ;;  %v3863_v30 = vld [vmem:[#allocation4 + $0xc0] sm:$0xf]  ;;  %v4627_v31 = vld [vmem:[#allocation4 + $0xcc] sm:$0xf0] }
  0xb4   :  { %1572 = vmatpush.bf16.msrb.mxu2 %v2992_v36  ;;  %1546 = vmatpush.bf16.msrb.mxu3 %v3628_v41  ;;  %v3424_v36 = vor.u32 %v4514_v24, %v3421_v26  ;;  %v4663_v24 = vld [vmem:[#allocation4 + $0x1ec] sm:$0xf0]  ;;  %v3767_v18 = vld [vmem:[#allocation4] sm:$0xf] }
  0xb5   :  { %1586 = vmatmul.bf16.vlgmr.msrb.gmra.mxu0 %v4915_v9  ;;  %v4957_v35 = vpop.f32.mrf.mxu2 }
  0xb6   :  { %1592 = vmatpush.bf16.msrb.mxu1 %v3344_v47  ;;  %1630 = vmatpush.bf16.msra.mxu0 %v3744_v54  ;;  %v4959_v41 = vpop.f32.mrf.mxu3  ;;  %v3261_v47 = vld [vmem:[#allocation2 + $0x238] sm:$0xf0] }
  0xb7   :  { %1547 = vmatmul.bf16.vlgmr.msrb.gmra.mxu3 %v4931_v39  ;;  %1573 = vmatmul.bf16.vlgmr.msrb.gmra.mxu2 %v4909_v57  ;;  %v4582_v57 = vld [vmem:[#allocation2 + $0x58c] sm:$0xf]  ;;  %v3264_v56 = vor.u32 %v4474_v46, %v3261_v47  ;;  %v4655_v46 = vld [vmem:[#allocation4 + $0x1ac] sm:$0xf0] }
  0xb8   :  { %1604 = vmatpush.bf16.msra.mxu3 %v3488_v44  ;;  %1617 = vmatpush.bf16.msra.mxu2 %v3616_v45  ;;  %v3696_v9 = vor.u32 %v4582_v57, %v3693_v21  ;;  %v3533_v44 = vld [vmem:[#allocation2 + $0x458] sm:$0xf0]  ;;  %v3680_v45 = vor.u32 %v4578_v32, %v3677_v33  ;;  %v4566_v57 = vld [vmem:[#allocation2 + $0x50c] sm:$0xf]  ;;  %v3991_v33 = vld [vmem:[#allocation4 + $0x1c0] sm:$0xf] }
  0xb9   :  { %v3536_v54 = vor.u32 %v4542_v43, %v3533_v44  ;;  %v4623_v43 = vld [vmem:[#allocation4 + $0xac] sm:$0xf0] }
  0xba   :  { %1593 = vmatpush.bf16.msrb.mxu1 %v3328_v0  ;;  %1631 = vmatpush.bf16.msra.mxu0 %v3728_v4  ;;  %v1303_v49 = vpop.f32.mrf.mxu0  ;;  %v3245_v0 = vld [vmem:[#allocation2 + $0x218] sm:$0xf0]  ;;  %v1316_v2 = vpop.f32.mrf.mxu1  ;;  %v4598_v4 = vld [vmem:[#allocation2 + $0x60c] sm:$0xf] }
  0xbb   :  { %v3248_v12 = vor.u32 %v4470_v63, %v3245_v0  ;;  %v3760_v21 = vor.u32 %v4598_v4, %v3757_v5  ;;  %v4619_v49 = vld [vmem:[#allocation4 + $0x8c] sm:$0xf0]  ;;  %v3927_v4 = vld [vmem:[#allocation4 + $0x140] sm:$0xf] }
  0xbc   :  { %1605 = vmatpush.bf16.msra.mxu3 %v3472_v61  ;;  %1618 = vmatpush.bf16.msra.mxu2 %v3600_v62  ;;  %v3517_v61 = vld [vmem:[#allocation2 + $0x438] sm:$0xf0]  ;;  %v3664_v62 = vor.u32 %v4574_v50, %v3661_v51  ;;  %v4611_v2 = vld [vmem:[#allocation4 + $0x4c] sm:$0xf0] }
  0xbd   :  { %v1329_v7 = vpop.f32.mrf.mxu2  ;;  %v4643_v5 = vld [vmem:[#allocation4 + $0x14c] sm:$0xf0] }
  0xbe   :  { %1594 = vmatpush.bf16.msrb.mxu1 %v3312_v13  ;;  %1632 = vmatpush.bf16.msra.mxu0 %v3712_v17  ;;  %v3373_v13 = vld [vmem:[#allocation2 + $0x318] sm:$0xf0]  ;;  %v1342_v16 = vpop.f32.mrf.mxu3  ;;  %v3648_v17 = vor.u32 %v4570_v1, %v3645_v3  ;;  %v3799_v1 = vld [vmem:[#allocation4 + $0x40] sm:$0xf]  ;;  %v3928_v14 = vor.u32 %v4643_v5, %v3927_v4  ;;  %v4679_v4 = vld [vmem:[#allocation4 + $0x26c] sm:$0xf0] }
  0xbf   :  { %v4639_v16 = vld [vmem:[#allocation4 + $0x12c] sm:$0xf0]  ;;  %v277_v5 = vperm.slane %v4964_v6, 1 }
  0xc0   :  { %1606 = vmatpush.bf16.msra.mxu3 %v3456_v10  ;;  %1619 = vmatpush.bf16.msra.mxu2 %v3584_v11  ;;  %v3520_v10 = vor.u32 %v4538_v59, %v3517_v61  ;;  %v4502_v11 = vld [vmem:[#allocation2 + $0x30c] sm:$0xf]  ;;  %v4615_v59 = vld [vmem:[#allocation4 + $0x6c] sm:$0xf0]  ;;  %v3943_v61 = vld [vmem:[#allocation4 + $0x160] sm:$0xf] }
  0xc1   :  { %v3376_v26 = vor.u32 %v4502_v11, %v3373_v13  ;;  %v4607_v13 = vld [vmem:[#allocation4 + $0x2c] sm:$0xf0] }
  0xc2   :  { %1595 = vmatpush.bf16.msrb.mxu1 %v3296_v25  ;;  %1633 = vmatpush.bf16.msra.mxu0 %v3696_v9  ;;  %v276_v25 = vperm.slane %v4964_v6, 0 }
  0xc4   :  { %1607 = vmatpush.bf16.msra.mxu3 %v3440_v22  ;;  %1620 = vmatpush.bf16.msra.mxu2 %v3568_v23  ;;  %v3629_v22 = vld [vmem:[#allocation2 + $0x518] sm:$0xf0]  ;;  %v4007_v23 = vld [vmem:[#allocation4 + $0x1e0] sm:$0xf] }
  0xc5   :  { %v3632_v9 = vor.u32 %v4566_v57, %v3629_v22  ;;  %v4008_v32 = vor.u32 %v4663_v24, %v4007_v23  ;;  %v4135_v22 = vld [vmem:[#allocation4 + $0x2e0] sm:$0xf]  ;;  %v4695_v23 = vld [vmem:[#allocation4 + $0x2ec] sm:$0xf0] }
  0xc6   :  { %1596 = vmatpush.bf16.msrb.mxu1 %v3280_v40  ;;  %1634 = vmatpush.bf16.msra.mxu0 %v3680_v45  ;;  %v4969_v38 = vpop.f32.mrf.mxu2  ;;  %v3864_v40 = vor.u32 %v4627_v31, %v3863_v30  ;;  %v3975_v45 = vld [vmem:[#allocation4 + $0x1a0] sm:$0xf]  ;;  %v4009_v30 = vld [vmem:[#allocation4 + $0x1f0] sm:$0xf0]  ;;  %v3768_v31 = vor.u32 %v4603_v19, %v3767_v18  ;;  %v4609_v19 = vld [vmem:[#allocation4 + $0x44] sm:$0xf] }
  0xc7   :  { %v3976_v50 = vor.u32 %v4655_v46, %v3975_v45  ;;  %v4657_v46 = vld [vmem:[#allocation4 + $0x1c4] sm:$0xf] }
  0xc8   :  { %1608 = vmatpush.bf16.msra.mxu3 %v3424_v36  ;;  %1621 = vmatpush.bf16.msra.mxu2 %v3552_v37  ;;  %v4659_v36 = vld [vmem:[#allocation4 + $0x1cc] sm:$0xf0]  ;;  %v1302_v37 = vadd.f32 %v4953_v20, %v276_v25  ;;  %v3831_v20 = vld [vmem:[#allocation4 + $0x80] sm:$0xf]  ;;  %v3881_v25 = vld [vmem:[#allocation4 + $0xf0] sm:$0xf0] }
  0xc9   :  { %v3992_v44 = vor.u32 %v4659_v36, %v3991_v33  ;;  %v3832_v58 = vor.u32 %v4619_v49, %v3831_v20  ;;  %v4103_v49 = vld [vmem:[#allocation4 + $0x2a0] sm:$0xf] }
  0xca   :  { %1597 = vmatpush.bf16.msrb.mxu1 %v3264_v56  ;;  %1635 = vmatpush.bf16.msra.mxu0 %v3664_v62  ;;  %v1315_v47 = vadd.f32 %v4955_v29, %v1302_v37  ;;  %v3815_v29 = vld [vmem:[#allocation4 + $0x60] sm:$0xf] }
  0xcb   :  { %v3816_v63 = vor.u32 %v4615_v59, %v3815_v29  ;;  %v4087_v29 = vld [vmem:[#allocation4 + $0x280] sm:$0xf]  ;;  %v4683_v59 = vld [vmem:[#allocation4 + $0x28c] sm:$0xf0] }
  0xcc   :  { %1609 = vmatpush.bf16.msra.mxu3 %v3408_v52  ;;  %1622 = vmatpush.bf16.msra.mxu2 %v3536_v54  ;;  %v3959_v52 = vld [vmem:[#allocation4 + $0x180] sm:$0xf]  ;;  %v4651_v54 = vld [vmem:[#allocation4 + $0x18c] sm:$0xf0]  ;;  %v1328_v55 = vadd.f32 %v4957_v35, %v1315_v47  ;;  %v3993_v47 = vld [vmem:[#allocation4 + $0x1d0] sm:$0xf0] }
  0xce   :  { %1598 = vmatpush.bf16.msrb.mxu1 %v3248_v12  ;;  %1636 = vmatpush.bf16.msra.mxu0 %v3648_v17  ;;  %v1353_v51 = vpop.f32.mrf.mxu0  ;;  %v1381_v56 = vpop.f32.mrf.mxu2  ;;  %v1341_v62 = vadd.f32 %v4959_v41, %v1328_v55  ;;  %v3783_v12 = vld [vmem:[#allocation4 + $0x20] sm:$0xf] }
  0xcf   :  { %v3784_v17 = vor.u32 %v4607_v13, %v3783_v12  ;;  %v3977_v56 = vld [vmem:[#allocation4 + $0x1b0] sm:$0xf0]  ;;  %v4645_v13 = vld [vmem:[#allocation4 + $0x164] sm:$0xf] }
  0xd0   :  { %1610 = vmatpush.bf16.msra.mxu3 %v3392_v8  ;;  %1623 = vmatpush.bf16.msra.mxu2 %v3520_v10  ;;  %v1354_v0 = vadd.f32 %v1353_v51, %v1341_v62  ;;  %v3800_v10 = vor.u32 %v4611_v2, %v3799_v1  ;;  %v4621_v51 = vld [vmem:[#allocation4 + $0xa4] sm:$0xf]  ;;  %v4088_v62 = vor.u32 %v4683_v59, %v4087_v29 }
  0xd1   :  { %1599 = vmatmul.bf16.vlgmr.msrb.gmra.mxu1 %v4907_v53  ;;  %v3848_v53 = vor.u32 %v4623_v43, %v3847_v42  ;;  %v4625_v42 = vld [vmem:[#allocation4 + $0xc4] sm:$0xf]  ;;  %v3865_v43 = vld [vmem:[#allocation4 + $0xd0] sm:$0xf0] }
  0xd2   :  { %1650 = vmatpush.bf16.msra.mxu1 %v3760_v21  ;;  %1637 = vmatpush.bf16.msra.mxu0 %v3632_v9  ;;  %v3912_v21 = vor.u32 %v4639_v16, %v3911_v15  ;;  %v4661_v9 = vld [vmem:[#allocation4 + $0x1e4] sm:$0xf]  ;;  %v3868_v20 = vor.u32 %v4625_v42, %v3865_v43  ;;  %v4055_v16 = vld [vmem:[#allocation4 + $0x240] sm:$0xf] }
  0xd3   :  { %v4601_v42 = vld [vmem:[#allocation4 + $0x4] sm:$0xf] }
  0xd4   :  { %1611 = vmatpush.bf16.msra.mxu3 %v3376_v26  ;;  %1624 = vmatpush.bf16.msra.mxu2 %v3504_v27  ;;  %v3895_v26 = vld [vmem:[#allocation4 + $0x100] sm:$0xf]  ;;  %v4635_v27 = vld [vmem:[#allocation4 + $0x10c] sm:$0xf0] }
  0xd5   :  { %1638 = vmatmul.bf16.vlgmr.msra.gmra.mxu0 %v4931_v39  ;;  %v4647_v39 = vld [vmem:[#allocation4 + $0x16c] sm:$0xf0]  ;;  %v3896_v37 = vor.u32 %v4635_v27, %v3895_v26 }
  0xd6   :  { %2455 = vmatpush.bf16.msrb.mxu1 %v4008_v32  ;;  %v3944_v3 = vor.u32 %v4647_v39, %v3943_v61  ;;  %v4977_v35 = vpop.f32.mrf.mxu3  ;;  %v1355_v7 = vpop.f32.mrf.mxu0  ;;  %v3833_v61 = vld [vmem:[#allocation4 + $0x90] sm:$0xf0] }
  0xd7   :  { %1612 = vmatmul.bf16.vlgmr.msra.gmra.mxu3 %v4911_v60  ;;  %1625 = vmatmul.bf16.vlgmr.msra.gmra.mxu2 %v4929_v34  ;;  %v1366_v60 = vpop.f32.mrf.mxu1  ;;  %v3960_v34 = vor.u32 %v4651_v54, %v3959_v52  ;;  %v3849_v52 = vld [vmem:[#allocation4 + $0xb0] sm:$0xf0]  ;;  %v3996_v54 = vor.u32 %v4657_v46, %v3993_v47  ;;  %v1393_v18 = vadd.f32 %v4977_v35, %v277_v5  ;;  %v4667_v46 = vld [vmem:[#allocation4 + $0x20c] sm:$0xf0]  ;;  %v3887_v47 = vld [vmem:[#allocation4 + $0xe8] sm:$0xf] }
  0xd8   :  { %2442 = vmatpush.bf16.msrb.mxu3 %v3880_v28  ;;  %v1367_v41 = vadd.f32 %v1366_v60, %v1354_v0  ;;  %v4136_v28 = vor.u32 %v4695_v23, %v4135_v22  ;;  %v4653_v60 = vld [vmem:[#allocation4 + $0x1a4] sm:$0xf]  ;;  %v3961_v0 = vld [vmem:[#allocation4 + $0x190] sm:$0xf0] }
  0xd9   :  { %v3980_v39 = vor.u32 %v4653_v60, %v3977_v56  ;;  %v4641_v23 = vld [vmem:[#allocation4 + $0x144] sm:$0xf] }
  0xda   :  { %2456 = vmatpush.bf16.msrb.mxu1 %v3992_v44  ;;  %v4981_v11 = vpop.f32.mrf.mxu2  ;;  %v1380_v57 = vadd.f32 %v4969_v38, %v1367_v41  ;;  %2468 = vmatpush.bf16.msrb.mxu2 %v4136_v28  ;;  %v4119_v38 = vld [vmem:[#allocation4 + $0x2c0] sm:$0xf]  ;;  %v4012_v44 = vor.u32 %v4661_v9, %v4009_v30  ;;  %v4671_v9 = vld [vmem:[#allocation4 + $0x22c] sm:$0xf0] }
  0xdb   :  { %v4039_v28 = vld [vmem:[#allocation4 + $0x220] sm:$0xf]  ;;  %v1406_v30 = vadd.f32 %v4981_v11, %v1393_v18  ;;  %v4015_v18 = vld [vmem:[#allocation4 + $0x1e8] sm:$0xf] }
  0xdc   :  { %2443 = vmatpush.bf16.msrb.mxu3 %v3864_v40  ;;  %v1656_v33 = vmax.f32 %v1380_v57, 0.0  ;;  %v4691_v40 = vld [vmem:[#allocation4 + $0x2cc] sm:$0xf0]  ;;  %v3801_v57 = vld [vmem:[#allocation4 + $0x50] sm:$0xf0] }
  0xdd   :  { %v4120_v45 = vor.u32 %v4691_v40, %v4119_v38  ;;  %v3804_v27 = vor.u32 %v4609_v19, %v3801_v57  ;;  %v3913_v38 = vld [vmem:[#allocation4 + $0x130] sm:$0xf0]  ;;  %v4664_v19 = vld [vmem:[#allocation4 + $0x1f4] sm:$0xf0] }
  0xde   :  { %2457 = vmatpush.bf16.msrb.mxu1 %v3976_v50  ;;  %v1394_v24 = vpop.f32.mrf.mxu3  ;;  %v4687_v50 = vld [vmem:[#allocation4 + $0x2ac] sm:$0xf0] }
  0xdf   :  { %v1368_v8 = vpop.f32.mrf.mxu1  ;;  %2469 = vmatpush.bf16.msrb.mxu2 %v4120_v45  ;;  %v4104_v55 = vor.u32 %v4687_v50, %v4103_v49  ;;  %v3929_v24 = vld [vmem:[#allocation4 + $0x150] sm:$0xf0]  ;;  %v4023_v45 = vld [vmem:[#allocation4 + $0x200] sm:$0xf]  ;;  %v4693_v49 = vld [vmem:[#allocation4 + $0x2e4] sm:$0xf] }
  0xe0   :  { %2444 = vmatpush.bf16.msrb.mxu3 %v3848_v53  ;;  %v4984_v53 = vpack.c.bf16 %v1656_v33, %v1656_v33  ;;  %v4613_v8 = vld [vmem:[#allocation4 + $0x64] sm:$0xf]  ;;  %v3932_v35 = vor.u32 %v4641_v23, %v3929_v24  ;;  %v4024_v11 = vor.u32 %v4667_v46, %v4023_v45  ;;  %v4137_v50 = vld [vmem:[#allocation4 + $0x2f0] sm:$0xf0]  ;;  %v4620_v23 = vld [vmem:[#allocation4 + $0x94] sm:$0xf0] }
  0xe1   :  { %3764 = vmatmul.msk.bf16.vlgmr.msra.gmra.mxu1 %vm1288_vm0, %v4922_v48  ;;  %v4629_v48 = vld [vmem:[#allocation4 + $0xe4] sm:$0xf]  ;;  %v4140_v60 = vor.u32 %v4693_v49, %v4137_v50  ;;  %v4215_v46 = vld [vmem:[#allocation4 + $0x380] sm:$0xf] }
  0xe2   :  { %2458 = vmatpush.bf16.msrb.mxu1 %v3960_v34  ;;  %v1407_v32 = vpop.f32.mrf.mxu2  ;;  %v3884_v36 = vor.u32 %v4629_v48, %v3881_v25  ;;  %v4617_v34 = vld [vmem:[#allocation4 + $0x84] sm:$0xf] }
  0xe3   :  { %2470 = vmatpush.bf16.msrb.mxu2 %v4104_v55  ;;  %v3836_v2 = vor.u32 %v4617_v34, %v3833_v61  ;;  %v3785_v32 = vld [vmem:[#allocation4 + $0x30] sm:$0xf0]  ;;  %v3871_v61 = vld [vmem:[#allocation4 + $0xc8] sm:$0xf]  ;;  %v4681_v24 = vld [vmem:[#allocation4 + $0x284] sm:$0xf] }
  0xe4   :  { %2445 = vmatpush.bf16.msrb.mxu3 %v3832_v58  ;;  %v3852_v58 = vor.u32 %v4621_v51, %v3849_v52  ;;  %v4632_v52 = vld [vmem:[#allocation4 + $0xf4] sm:$0xf0]  ;;  %v3897_v55 = vld [vmem:[#allocation4 + $0x110] sm:$0xf0] }
  0xe5   :  { %v3888_v34 = vor.u32 %v4632_v52, %v3887_v47  ;;  %v4715_v47 = vld [vmem:[#allocation4 + $0x38c] sm:$0xf0]  ;;  %v3807_v52 = vld [vmem:[#allocation4 + $0x48] sm:$0xf] }
  0xe6   :  { %2459 = vmatpush.bf16.msrb.mxu1 %v3944_v3  ;;  %v4071_v3 = vld [vmem:[#allocation4 + $0x260] sm:$0xf]  ;;  %v4216_v49 = vor.u32 %v4715_v47, %v4215_v46  ;;  %v4725_v46 = vld [vmem:[#allocation4 + $0x3e4] sm:$0xf]  ;;  %v4265_v47 = vld [vmem:[#allocation4 + $0x3f0] sm:$0xf0] }
  0xe7   :  { %2471 = vmatpush.bf16.msrb.mxu2 %v4088_v62  ;;  %v4072_v12 = vor.u32 %v4679_v4, %v4071_v3  ;;  %v4689_v62 = vld [vmem:[#allocation4 + $0x2c4] sm:$0xf]  ;;  %v4727_v3 = vld [vmem:[#allocation4 + $0x3ec] sm:$0xf0] }
  0xe8   :  { %2446 = vmatpush.bf16.msrb.mxu3 %v3816_v63  ;;  %v4649_v63 = vld [vmem:[#allocation4 + $0x184] sm:$0xf] }
  0xe9   :  { %v3964_v41 = vor.u32 %v4649_v63, %v3961_v0  ;;  %v4121_v63 = vld [vmem:[#allocation4 + $0x2d0] sm:$0xf0]  ;;  %v4628_v0 = vld [vmem:[#allocation4 + $0xd4] sm:$0xf0] }
  0xea   :  { %2460 = vmatpush.bf16.msrb.mxu1 %v3928_v14  ;;  %v3945_v14 = vld [vmem:[#allocation4 + $0x170] sm:$0xf0] }
  0xeb   :  { %2472 = vmatpush.bf16.msrb.mxu2 %v4072_v12  ;;  %v3948_v48 = vor.u32 %v4645_v13, %v3945_v14  ;;  %v4624_v13 = vld [vmem:[#allocation4 + $0xb4] sm:$0xf0] }
  0xec   :  { %2447 = vmatpush.bf16.msrb.mxu3 %v3800_v10  ;;  %v3817_v10 = vld [vmem:[#allocation4 + $0x70] sm:$0xf0] }
  0xed   :  { %v3820_v15 = vor.u32 %v4613_v8, %v3817_v10  ;;  %v3855_v8 = vld [vmem:[#allocation4 + $0xa8] sm:$0xf]  ;;  %v4685_v10 = vld [vmem:[#allocation4 + $0x2a4] sm:$0xf] }
  0xee   :  { %2461 = vmatpush.bf16.msrb.mxu1 %v3912_v21  ;;  %v1418_v1 = vpop.f32.mrf.mxu0  ;;  %v1431_v7 = vpop.f32.mrf.mxu1 }
  0xef   :  { %v1419_v40 = vadd.f32 %v1418_v1, %v1406_v30  ;;  %v4124_v1 = vor.u32 %v4689_v62, %v4121_v63  ;;  %v3999_v30 = vld [vmem:[#allocation4 + $0x1c8] sm:$0xf] }
  0xf0   :  { %2448 = vmatpush.bf16.msrb.mxu3 %v3784_v17  ;;  %v4675_v17 = vld [vmem:[#allocation4 + $0x24c] sm:$0xf0]  ;;  %v3791_v63 = vld [vmem:[#allocation4 + $0x28] sm:$0xf] }
  0xf1   :  { %v4056_v21 = vor.u32 %v4675_v17, %v4055_v16  ;;  %v1432_v56 = vadd.f32 %v1431_v7, %v1419_v40  ;;  %v3872_v7 = vor.u32 %v4628_v0, %v3871_v61  ;;  %v4723_v16 = vld [vmem:[#allocation4 + $0x3cc] sm:$0xf0]  ;;  %v4652_v61 = vld [vmem:[#allocation4 + $0x194] sm:$0xf0]  ;;  %v4669_v0 = vld [vmem:[#allocation4 + $0x224] sm:$0xf] }
  0xf2   :  { %2462 = vmatpush.bf16.msrb.mxu1 %v3896_v37  ;;  %v4637_v37 = vld [vmem:[#allocation4 + $0x124] sm:$0xf] }
  0xf3   :  { %2473 = vmatpush.bf16.msrb.mxu2 %v4056_v21 }
  0xf4   :  { %2449 = vmatpush.bf16.msrb.mxu3 %v3768_v31  ;;  %v4605_v31 = vld [vmem:[#allocation4 + $0x24] sm:$0xf] }
  0xf5   :  { %v3788_v43 = vor.u32 %v4605_v31, %v3785_v32  ;;  %v4660_v31 = vld [vmem:[#allocation4 + $0x1d4] sm:$0xf0] }
  0xf6   :  { %2507 = vmatpush.bf16.msra.mxu1 %v4012_v44  ;;  %v1444_v22 = vpop.f32.mrf.mxu3  ;;  %v1420_v25 = vpop.f32.mrf.mxu0  ;;  %v3769_v44 = vld [vmem:[#allocation4 + $0x10] sm:$0xf0] }
  0xf7   :  { %2450 = vmatmul.bf16.vlgmr.msrb.gmra.mxu3 %v4984_v53  ;;  %v1433_v33 = vpop.f32.mrf.mxu1  ;;  %v1445_v59 = vadd.f32 %v1444_v22, %v1432_v56  ;;  %v3856_v22 = vor.u32 %v4624_v13, %v3855_v8  ;;  %v4016_v25 = vor.u32 %v4664_v19, %v4015_v18  ;;  %v4612_v56 = vld [vmem:[#allocation4 + $0x54] sm:$0xf0]  ;;  %v4183_v8 = vld [vmem:[#allocation4 + $0x340] sm:$0xf]  ;;  %v4665_v19 = vld [vmem:[#allocation4 + $0x204] sm:$0xf] }
  0xf8   :  { %2494 = vmatpush.bf16.msra.mxu3 %v3884_v36  ;;  %v4040_v36 = vor.u32 %v4671_v9, %v4039_v28  ;;  %v4719_v28 = vld [vmem:[#allocation4 + $0x3ac] sm:$0xf0]  ;;  %v3808_v62 = vor.u32 %v4612_v56, %v3807_v52  ;;  %v4604_v18 = vld [vmem:[#allocation4 + $0x14] sm:$0xf0]  ;;  %v3857_v56 = vld [vmem:[#allocation4 + $0xb8] sm:$0xf0] }
  0xfa   :  { %2508 = vmatpush.bf16.msra.mxu1 %v3996_v54  ;;  %v1457_v26 = vpop.f32.mrf.mxu2  ;;  %2474 = vmatpush.bf16.msrb.mxu2 %v4040_v36  ;;  %v4633_v54 = vld [vmem:[#allocation4 + $0x104] sm:$0xf]  ;;  %v3823_v36 = vld [vmem:[#allocation4 + $0x68] sm:$0xf] }
  0xfb   :  { %v1458_v5 = vadd.f32 %v1457_v26, %v1445_v59  ;;  %v4089_v26 = vld [vmem:[#allocation4 + $0x290] sm:$0xf0]  ;;  %v4711_v59 = vld [vmem:[#allocation4 + $0x36c] sm:$0xf0] }
  0xfc   :  { %2495 = vmatpush.bf16.msra.mxu3 %v3868_v20  ;;  %v3916_v20 = vor.u32 %v4637_v37, %v3913_v38  ;;  %v4092_v32 = vor.u32 %v4681_v24, %v4089_v26  ;;  %v4677_v37 = vld [vmem:[#allocation4 + $0x264] sm:$0xf]  ;;  %v4073_v38 = vld [vmem:[#allocation4 + $0x270] sm:$0xf0]  ;;  %v4703_v24 = vld [vmem:[#allocation4 + $0x32c] sm:$0xf0] }
  0xfd   :  { %v4076_v45 = vor.u32 %v4677_v37, %v4073_v38  ;;  %v4630_v26 = vld [vmem:[#allocation4 + $0xec] sm:$0xf] }
  0xfe   :  { %2509 = vmatpush.bf16.msra.mxu1 %v3980_v39  ;;  %v1446_v51 = vpop.f32.mrf.mxu3  ;;  %2475 = vmatpush.bf16.msrb.mxu2 %v4024_v11  ;;  %v3900_v39 = vor.u32 %v4633_v54, %v3897_v55  ;;  %v4656_v11 = vld [vmem:[#allocation4 + $0x1b4] sm:$0xf0]  ;;  %v4673_v54 = vld [vmem:[#allocation4 + $0x244] sm:$0xf]  ;;  %v4057_v55 = vld [vmem:[#allocation4 + $0x250] sm:$0xf0] }
 0x100   :  { %2496 = vmatpush.bf16.msra.mxu3 %v3852_v58  ;;  %v3772_v58 = vor.u32 %v4601_v42, %v3769_v44  ;;  %v4616_v44 = vld [vmem:[#allocation4 + $0x74] sm:$0xf0] }
 0x101   :  { %v3824_v51 = vor.u32 %v4616_v44, %v3823_v36  ;;  %v4626_v36 = vld [vmem:[#allocation4 + $0xcc] sm:$0xf]  ;;  %v3873_v44 = vld [vmem:[#allocation4 + $0xd8] sm:$0xf0] }
 0x102   :  { %2510 = vmatpush.bf16.msra.mxu1 %v3964_v41  ;;  %v1459_v29 = vpop.f32.mrf.mxu2  ;;  %2520 = vmatpush.bf16.msra.mxu2 %v4140_v60  ;;  %v4105_v41 = vld [vmem:[#allocation4 + $0x2b0] sm:$0xf0]  ;;  %v3876_v52 = vor.u32 %v4626_v36, %v3873_v44  ;;  %v3793_v44 = vld [vmem:[#allocation4 + $0x38] sm:$0xf0] }
 0x103   :  { %v4108_v14 = vor.u32 %v4685_v10, %v4105_v41  ;;  %v4199_v29 = vld [vmem:[#allocation4 + $0x360] sm:$0xf]  ;;  %v4707_v10 = vld [vmem:[#allocation4 + $0x34c] sm:$0xf0]  ;;  %v3951_v41 = vld [vmem:[#allocation4 + $0x168] sm:$0xf] }
 0x104   :  { %2497 = vmatpush.bf16.msra.mxu3 %v3836_v2  ;;  %v4263_v2 = vld [vmem:[#allocation4 + $0x3e0] sm:$0xf]  ;;  %v4184_v13 = vor.u32 %v4707_v10, %v4183_v8  ;;  %v4658_v10 = vld [vmem:[#allocation4 + $0x1cc] sm:$0xf] }
 0x105   :  { %v4264_v4 = vor.u32 %v4727_v3, %v4263_v2 }
 0x106   :  { %2511 = vmatpush.bf16.msra.mxu1 %v3948_v48  ;;  %2521 = vmatpush.bf16.msra.mxu2 %v4124_v1  ;;  %v1470_v12 = vpop.f32.mrf.mxu3  ;;  %v3839_v48 = vld [vmem:[#allocation4 + $0x88] sm:$0xf]  ;;  %v4041_v1 = vld [vmem:[#allocation4 + $0x230] sm:$0xf0] }
 0x107   :  { %2481 = vmatpush.bf16.msrb.mxu0 %v4264_v4  ;;  %v1471_v17 = vadd.f32 %v1470_v12, %v1458_v5  ;;  %v3840_v33 = vor.u32 %v4620_v23, %v3839_v48  ;;  %v4608_v5 = vld [vmem:[#allocation4 + $0x34] sm:$0xf0]  ;;  %v4167_v23 = vld [vmem:[#allocation4 + $0x320] sm:$0xf] }
 0x108   :  { %2498 = vmatpush.bf16.msra.mxu3 %v3820_v15  ;;  %v4247_v15 = vld [vmem:[#allocation4 + $0x3c0] sm:$0xf]  ;;  %v4648_v12 = vld [vmem:[#allocation4 + $0x174] sm:$0xf0] }
 0x109   :  { %v4248_v57 = vor.u32 %v4723_v16, %v4247_v15  ;;  %v1657_v21 = vmax.f32 %v1471_v17, 0.0  ;;  %v3775_v15 = vld [vmem:[#allocation4 + $0x8] sm:$0xf]  ;;  %v3792_v17 = vor.u32 %v4608_v5, %v3791_v63  ;;  %v3952_v48 = vor.u32 %v4648_v12, %v3951_v41  ;;  %v4717_v5 = vld [vmem:[#allocation4 + $0x3a4] sm:$0xf] }
 0x10a   :  { %2512 = vmatpush.bf16.msra.mxu1 %v3932_v35  ;;  %2522 = vmatpush.bf16.msra.mxu2 %v4108_v14 }
 0x10b   :  { %2482 = vmatpush.bf16.msrb.mxu0 %v4248_v57  ;;  %v4991_v9 = vpack.c.bf16 %v1657_v21, %v1657_v21  ;;  %v4025_v57 = vld [vmem:[#allocation4 + $0x210] sm:$0xf0]  ;;  %v3935_v21 = vld [vmem:[#allocation4 + $0x148] sm:$0xf] }
 0x10c   :  { %2499 = vmatpush.bf16.msra.mxu3 %v3804_v27  ;;  %v4231_v27 = vld [vmem:[#allocation4 + $0x3a0] sm:$0xf] }
 0x10d   :  { %v4232_v35 = vor.u32 %v4719_v28, %v4231_v27  ;;  %2463 = vmatmul.bf16.vlgmr.msrb.gmra.mxu1 %v4991_v9  ;;  %v3889_v27 = vld [vmem:[#allocation4 + $0xf8] sm:$0xf0]  ;;  %v4168_v28 = vor.u32 %v4703_v24, %v4167_v23  ;;  %v4610_v23 = vld [vmem:[#allocation4 + $0x4c] sm:$0xf] }
 0x10e   :  { %2513 = vmatpush.bf16.msra.mxu1 %v3916_v20  ;;  %v1472_v40 = vpop.f32.mrf.mxu3  ;;  %v4994_v42 = vpop.f32.mrf.mxu0  ;;  %2523 = vmatpush.bf16.msra.mxu2 %v4092_v32  ;;  %v3983_v20 = vld [vmem:[#allocation4 + $0x1a8] sm:$0xf]  ;;  %v4640_v32 = vld [vmem:[#allocation4 + $0x134] sm:$0xf0] }
 0x10f   :  { %2483 = vmatpush.bf16.msrb.mxu0 %v4232_v35  ;;  %v4996_v50 = vpop.f32.mrf.mxu1  ;;  %v3984_v60 = vor.u32 %v4656_v11, %v3983_v20  ;;  %v4151_v40 = vld [vmem:[#allocation4 + $0x300] sm:$0xf]  ;;  %v278_v20 = vperm.slane %v4964_v6, 2 }
 0x110   :  { %2500 = vmatpush.bf16.msra.mxu3 %v3788_v43  ;;  %v4000_v43 = vor.u32 %v4660_v31, %v3999_v30  ;;  %v3776_v30 = vor.u32 %v4604_v18, %v3775_v15  ;;  %v3919_v31 = vld [vmem:[#allocation4 + $0x128] sm:$0xf]  ;;  %v4614_v15 = vld [vmem:[#allocation4 + $0x6c] sm:$0xf]  ;;  %v4713_v18 = vld [vmem:[#allocation4 + $0x384] sm:$0xf] }
 0x112   :  { %2514 = vmatpush.bf16.msra.mxu1 %v3900_v39  ;;  %2524 = vmatpush.bf16.msra.mxu2 %v4076_v45  ;;  %v4200_v39 = vor.u32 %v4711_v59, %v4199_v29  ;;  %v4249_v29 = vld [vmem:[#allocation4 + $0x3d0] sm:$0xf0]  ;;  %v1484_v59 = vadd.f32 %v4996_v50, %v278_v20  ;;  %v4001_v50 = vld [vmem:[#allocation4 + $0x1d8] sm:$0xf0]  ;;  %v4646_v20 = vld [vmem:[#allocation4 + $0x16c] sm:$0xf] }
 0x113   :  { %2484 = vmatpush.bf16.msrb.mxu0 %v4216_v49  ;;  %v4268_v49 = vor.u32 %v4725_v46, %v4265_v47  ;;  %v4185_v46 = vld [vmem:[#allocation4 + $0x350] sm:$0xf0] }
 0x114   :  { %2501 = vmatpush.bf16.msra.mxu3 %v3772_v58  ;;  %v4060_v58 = vor.u32 %v4673_v54, %v4057_v55  ;;  %v3903_v54 = vld [vmem:[#allocation4 + $0x108] sm:$0xf]  ;;  %v4636_v55 = vld [vmem:[#allocation4 + $0x114] sm:$0xf0] }
 0x116   :  { %2559 = vmatpush.bf16.msrb.mxu1 %v4016_v25  ;;  %v1511_v3 = vpop.f32.mrf.mxu0  ;;  %2525 = vmatpush.bf16.msra.mxu2 %v4060_v58  ;;  %v4644_v25 = vld [vmem:[#allocation4 + $0x154] sm:$0xf0]  ;;  %v4721_v58 = vld [vmem:[#allocation4 + $0x3c4] sm:$0xf] }
 0x117   :  { %2502 = vmatmul.bf16.vlgmr.msra.gmra.mxu3 %v4984_v53  ;;  %2485 = vmatpush.bf16.msrb.mxu0 %v4200_v39  ;;  %v1485_v16 = vpop.f32.mrf.mxu1  ;;  %v3936_v35 = vor.u32 %v4644_v25, %v3935_v21  ;;  %v4252_v39 = vor.u32 %v4721_v58, %v4249_v29  ;;  %v3985_v21 = vld [vmem:[#allocation4 + $0x1b8] sm:$0xf0]  ;;  %v4701_v29 = vld [vmem:[#allocation4 + $0x324] sm:$0xf] }
 0x118   :  { %2546 = vmatpush.bf16.msrb.mxu3 %v3888_v34  ;;  %v3967_v34 = vld [vmem:[#allocation4 + $0x188] sm:$0xf]  ;;  %v4004_v16 = vor.u32 %v4658_v10, %v4001_v50  ;;  %v3809_v25 = vld [vmem:[#allocation4 + $0x58] sm:$0xf0]  ;;  %v4153_v10 = vld [vmem:[#allocation4 + $0x310] sm:$0xf0] }
 0x119   :  { %v3968_v4 = vor.u32 %v4652_v61, %v3967_v34  ;;  %v4662_v34 = vld [vmem:[#allocation4 + $0x1ec] sm:$0xf]  ;;  %v4017_v61 = vld [vmem:[#allocation4 + $0x1f8] sm:$0xf0] }
 0x11a   :  { %2560 = vmatpush.bf16.msrb.mxu1 %v4000_v43  ;;  %v4998_v2 = vpop.f32.mrf.mxu3  ;;  %v5000_v14 = vpop.f32.mrf.mxu2  ;;  %v4699_v43 = vld [vmem:[#allocation4 + $0x30c] sm:$0xf0]  ;;  %v4020_v3 = vor.u32 %v4662_v34, %v4017_v61  ;;  %v3777_v58 = vld [vmem:[#allocation4 + $0x18] sm:$0xf0]  ;;  %v4642_v61 = vld [vmem:[#allocation4 + $0x14c] sm:$0xf] }
 0x11b   :  { %2486 = vmatpush.bf16.msrb.mxu0 %v4184_v13  ;;  %v4152_v45 = vor.u32 %v4699_v43, %v4151_v40  ;;  %v1497_v8 = vadd.f32 %v4998_v2, %v1484_v59  ;;  %v4169_v59 = vld [vmem:[#allocation4 + $0x330] sm:$0xf0]  ;;  %v4638_v50 = vld [vmem:[#allocation4 + $0x12c] sm:$0xf] }
 0x11c   :  { %2547 = vmatpush.bf16.msrb.mxu3 %v3872_v7  ;;  %v4044_v7 = vor.u32 %v4669_v0, %v4041_v1  ;;  %v4618_v0 = vld [vmem:[#allocation4 + $0x8c] sm:$0xf] }
 0x11d   :  { %2515 = vmatmul.bf16.vlgmr.msra.gmra.mxu1 %v4991_v9 }
 0x11e   :  { %2561 = vmatpush.bf16.msrb.mxu1 %v3984_v60  ;;  %2526 = vmatpush.bf16.msra.mxu2 %v4044_v7  ;;  %v5003_v38 = vpop.f32.mrf.mxu0  ;;  %v4622_v60 = vld [vmem:[#allocation4 + $0xac] sm:$0xf]  ;;  %v4233_v7 = vld [vmem:[#allocation4 + $0x3b0] sm:$0xf0] }
 0x11f   :  { %2487 = vmatpush.bf16.msrb.mxu0 %v4168_v28  ;;  %v3860_v63 = vor.u32 %v4622_v60, %v3857_v56  ;;  %v4236_v41 = vor.u32 %v4717_v5, %v4233_v7  ;;  %v4602_v60 = vld [vmem:[#allocation4 + $0xc] sm:$0xf] }
 0x120   :  { %2548 = vmatpush.bf16.msrb.mxu3 %v3856_v22  ;;  %v4028_v22 = vor.u32 %v4665_v19, %v4025_v57  ;;  %v4217_v19 = vld [vmem:[#allocation4 + $0x390] sm:$0xf0]  ;;  %v1510_v57 = vadd.f32 %v4994_v42, %v1497_v8  ;;  %v4697_v8 = vld [vmem:[#allocation4 + $0x304] sm:$0xf] }
 0x121   :  { %v4220_v2 = vor.u32 %v4713_v18, %v4217_v19  ;;  %v4634_v19 = vld [vmem:[#allocation4 + $0x10c] sm:$0xf] }
 0x122   :  { %2562 = vmatpush.bf16.msrb.mxu1 %v3968_v4  ;;  %v1498_v37 = vpop.f32.mrf.mxu3  ;;  %2527 = vmatpush.bf16.msra.mxu2 %v4028_v22  ;;  %v1524_v11 = vpop.f32.mrf.mxu2  ;;  %v3841_v4 = vld [vmem:[#allocation4 + $0x98] sm:$0xf0]  ;;  %v1523_v28 = vadd.f32 %v5000_v14, %v1510_v57 }
 0x123   :  { %2488 = vmatpush.bf16.msrb.mxu0 %v4152_v45  ;;  %v3844_v13 = vor.u32 %v4618_v0, %v3841_v4  ;;  %v4606_v37 = vld [vmem:[#allocation4 + $0x2c] sm:$0xf]  ;;  %v4705_v45 = vld [vmem:[#allocation4 + $0x344] sm:$0xf]  ;;  %v3953_v14 = vld [vmem:[#allocation4 + $0x178] sm:$0xf0] }
 0x124   :  { %2549 = vmatpush.bf16.msrb.mxu3 %v3840_v33  ;;  %v3892_v33 = vor.u32 %v4630_v26, %v3889_v27  ;;  %v4709_v26 = vld [vmem:[#allocation4 + $0x364] sm:$0xf]  ;;  %v4201_v27 = vld [vmem:[#allocation4 + $0x370] sm:$0xf0]  ;;  %v3956_v56 = vor.u32 %v4646_v20, %v3953_v14  ;;  %v4692_v4 = vld [vmem:[#allocation4 + $0x2d4] sm:$0xf0] }
 0x125   :  { %v4204_v42 = vor.u32 %v4709_v26, %v4201_v27  ;;  %v3905_v57 = vld [vmem:[#allocation4 + $0x118] sm:$0xf0]  ;;  %v4680_v26 = vld [vmem:[#allocation4 + $0x274] sm:$0xf0]  ;;  %v4694_v14 = vld [vmem:[#allocation4 + $0x2ec] sm:$0xf] }
 0x126   :  { %2563 = vmatpush.bf16.msrb.mxu1 %v3952_v48  ;;  %v1563_v1 = vpop.f32.mrf.mxu0  ;;  %v4654_v48 = vld [vmem:[#allocation4 + $0x1ac] sm:$0xf] }
 0x127   :  { %2533 = vmatpush.bf16.msra.mxu0 %v4268_v49  ;;  %v3988_v24 = vor.u32 %v4654_v48, %v3985_v21  ;;  %v4188_v49 = vor.u32 %v4705_v45, %v4185_v46  ;;  %v4095_v21 = vld [vmem:[#allocation4 + $0x288] sm:$0xf] }
 0x128   :  { %2550 = vmatpush.bf16.msrb.mxu3 %v3824_v51  ;;  %v3920_v51 = vor.u32 %v4640_v32, %v3919_v31  ;;  %v3969_v31 = vld [vmem:[#allocation4 + $0x198] sm:$0xf0] }
 0x12a   :  { %2564 = vmatpush.bf16.msrb.mxu1 %v3936_v35 }
 0x12b   :  { %2534 = vmatpush.bf16.msra.mxu0 %v4252_v39  ;;  %v3937_v39 = vld [vmem:[#allocation4 + $0x158] sm:$0xf0] }
 0x12c   :  { %2551 = vmatpush.bf16.msrb.mxu3 %v3808_v62  ;;  %v3904_v62 = vor.u32 %v4636_v55, %v3903_v54  ;;  %v4143_v54 = vld [vmem:[#allocation4 + $0x2e8] sm:$0xf]  ;;  %v4696_v55 = vld [vmem:[#allocation4 + $0x2f4] sm:$0xf0]  ;;  %v3940_v5 = vor.u32 %v4642_v61, %v3937_v39 }
 0x12d   :  { %v4144_v0 = vor.u32 %v4696_v55, %v4143_v54  ;;  %v4690_v55 = vld [vmem:[#allocation4 + $0x2cc] sm:$0xf] }
 0x12e   :  { %2565 = vmatpush.bf16.msrb.mxu1 %v3920_v51  ;;  %v1535_v12 = vpop.f32.mrf.mxu1 }
 0x12f   :  { %2535 = vmatpush.bf16.msra.mxu0 %v4236_v41  ;;  %v1536_v35 = vadd.f32 %v1535_v12, %v1523_v28  ;;  %v3921_v41 = vld [vmem:[#allocation4 + $0x138] sm:$0xf0] }
 0x130   :  { %2552 = vmatpush.bf16.msrb.mxu3 %v3792_v17  ;;  %v3825_v17 = vld [vmem:[#allocation4 + $0x78] sm:$0xf0]  ;;  %v3924_v18 = vor.u32 %v4638_v50, %v3921_v41  ;;  %v4239_v41 = vld [vmem:[#allocation4 + $0x3a8] sm:$0xf] }
 0x131   :  { %v3828_v22 = vor.u32 %v4614_v15, %v3825_v17  ;;  %v4688_v17 = vld [vmem:[#allocation4 + $0x2b4] sm:$0xf0]  ;;  %v4097_v50 = vld [vmem:[#allocation4 + $0x298] sm:$0xf0] }
 0x132   :  { %2566 = vmatpush.bf16.msrb.mxu1 %v3904_v62  ;;  %v5012_v32 = vpop.f32.mrf.mxu0 }
 0x133   :  { %2536 = vmatpush.bf16.msra.mxu0 %v4220_v2  ;;  %v4684_v2 = vld [vmem:[#allocation4 + $0x294] sm:$0xf0] }
 0x134   :  { %2553 = vmatpush.bf16.msrb.mxu3 %v3776_v30  ;;  %v4650_v30 = vld [vmem:[#allocation4 + $0x18c] sm:$0xf] }
 0x135   :  { %2567 = vmatmul.bf16.vlgmr.msrb.gmra.mxu1 %v4991_v9  ;;  %v3972_v43 = vor.u32 %v4650_v30, %v3969_v31  ;;  %v4063_v31 = vld [vmem:[#allocation4 + $0x248] sm:$0xf] }
 0x136   :  { %2611 = vmatpush.bf16.msra.mxu1 %v4020_v3  ;;  %v1537_v36 = vpop.f32.mrf.mxu1  ;;  %v4127_v3 = vld [vmem:[#allocation4 + $0x2c8] sm:$0xf] }
 0x137   :  { %2554 = vmatmul.bf16.vlgmr.msrb.gmra.mxu3 %v4984_v53  ;;  %2537 = vmatpush.bf16.msra.mxu0 %v4204_v42  ;;  %v4128_v15 = vor.u32 %v4692_v4, %v4127_v3  ;;  %v4672_v36 = vld [vmem:[#allocation4 + $0x234] sm:$0xf0]  ;;  %v4255_v3 = vld [vmem:[#allocation4 + $0x3c8] sm:$0xf] }
 0x138   :  { %2598 = vmatpush.bf16.msra.mxu3 %v3892_v33  ;;  %v3812_v33 = vor.u32 %v4610_v23, %v3809_v25  ;;  %v3908_v23 = vor.u32 %v4634_v19, %v3905_v57  ;;  %v4079_v25 = vld [vmem:[#allocation4 + $0x268] sm:$0xf]  ;;  %v4724_v4 = vld [vmem:[#allocation4 + $0x3d4] sm:$0xf0] }
 0x139   :  { %v4080_v30 = vor.u32 %v4680_v26, %v4079_v25  ;;  %v4716_v19 = vld [vmem:[#allocation4 + $0x394] sm:$0xf0]  ;;  %v4670_v26 = vld [vmem:[#allocation4 + $0x22c] sm:$0xf] }
 0x13a   :  { %2612 = vmatpush.bf16.msra.mxu1 %v4004_v16  ;;  %v1548_v40 = vpop.f32.mrf.mxu3  ;;  %v1574_v11 = vpop.f32.mrf.mxu2  ;;  %v4111_v16 = vld [vmem:[#allocation4 + $0x2a8] sm:$0xf] }
 0x13b   :  { %v1549_v47 = vadd.f32 %v1548_v40, %v1536_v35  ;;  %v1589_v62 = vpop.f32.mrf.mxu0  ;;  %2538 = vmatpush.bf16.msra.mxu0 %v4188_v49  ;;  %v4112_v48 = vor.u32 %v4688_v17, %v4111_v16  ;;  %v4678_v16 = vld [vmem:[#allocation4 + $0x26c] sm:$0xf]  ;;  %v4081_v17 = vld [vmem:[#allocation4 + $0x278] sm:$0xf0] }
 0x13c   :  { %2599 = vmatpush.bf16.msra.mxu3 %v3876_v52  ;;  %v3796_v52 = vor.u32 %v4606_v37, %v3793_v44  ;;  %v4084_v57 = vor.u32 %v4678_v16, %v4081_v17 }
 0x13d   :  { %v1562_v51 = vadd.f32 %v5003_v38, %v1549_v47  ;;  %v3780_v38 = vor.u32 %v4602_v60, %v3777_v58  ;;  %v4031_v47 = vld [vmem:[#allocation4 + $0x208] sm:$0xf]  ;;  %v4129_v60 = vld [vmem:[#allocation4 + $0x2d8] sm:$0xf0] }
 0x13e   :  { %2613 = vmatpush.bf16.msra.mxu1 %v3988_v24  ;;  %v4096_v24 = vor.u32 %v4684_v2, %v4095_v21  ;;  %v4132_v39 = vor.u32 %v4690_v55, %v4129_v60  ;;  %v4674_v21 = vld [vmem:[#allocation4 + $0x24c] sm:$0xf]  ;;  %v4065_v2 = vld [vmem:[#allocation4 + $0x258] sm:$0xf0]  ;;  %v5033_v60 = vld [vmem:[%s5062_s4] sm:$0xf] }
 0x13f   :  { %v1658_v34 = vmax.f32 %v1562_v51, 0.0  ;;  %v4225_v55 = vld [vmem:[#allocation4 + $0x398] sm:$0xf0] }
 0x140   :  { %2600 = vmatpush.bf16.msra.mxu3 %v3860_v63  ;;  %v4172_v63 = vor.u32 %v4701_v29, %v4169_v59  ;;  %v4271_v29 = vld [vmem:[#allocation4 + $0x3e8] sm:$0xf]  ;;  %v4728_v59 = vld [vmem:[#allocation4 + $0x3f4] sm:$0xf0] }
 0x141   :  { %v5015_v1 = vpack.c.bf16 %v1658_v34, %v1658_v34  ;;  %v4272_v62 = vor.u32 %v4728_v59, %v4271_v29  ;;  %v4209_v29 = vld [vmem:[#allocation4 + $0x378] sm:$0xf0] }
 0x142   :  { %2614 = vmatpush.bf16.msra.mxu1 %v3972_v43  ;;  %v1550_v7 = vpop.f32.mrf.mxu3  ;;  %v1576_v12 = vpop.f32.mrf.mxu2  ;;  %2539 = vmatpush.bf16.msra.mxu0 %v4172_v63  ;;  %v4686_v63 = vld [vmem:[#allocation4 + $0x2ac] sm:$0xf] }
 0x143   :  { %2476 = vmatmul.bf16.vlgmr.msrb.gmra.mxu2 %v5015_v1  ;;  %v4720_v12 = vld [vmem:[#allocation4 + $0x3b4] sm:$0xf0] }
 0x144   :  { %2601 = vmatpush.bf16.msra.mxu3 %v3844_v13  ;;  %v4156_v13 = vor.u32 %v4697_v8, %v4153_v10  ;;  %2572 = vmatpush.bf16.msrb.mxu2 %v4144_v0  ;;  %v4113_v0 = vld [vmem:[#allocation4 + $0x2b8] sm:$0xf0]  ;;  %v4256_v8 = vor.u32 %v4724_v4, %v4255_v3  ;;  %v4682_v10 = vld [vmem:[#allocation4 + $0x28c] sm:$0xf] }
 0x145   :  { %v4702_v4 = vld [vmem:[#allocation4 + $0x32c] sm:$0xf] }
 0x146   :  { %2615 = vmatpush.bf16.msra.mxu1 %v3956_v56  ;;  %2540 = vmatpush.bf16.msra.mxu0 %v4156_v13  ;;  %v4100_v13 = vor.u32 %v4682_v10, %v4097_v50  ;;  %v4161_v10 = vld [vmem:[#allocation4 + $0x318] sm:$0xf0] }
 0x148   :  { %2602 = vmatpush.bf16.msra.mxu3 %v3828_v22  ;;  %2573 = vmatpush.bf16.msrb.mxu2 %v4128_v15  ;;  %v279_v22 = vperm.slane %v4964_v6, 3  ;;  %v4240_v15 = vor.u32 %v4720_v12, %v4239_v41 }
 0x14a   :  { %2616 = vmatpush.bf16.msra.mxu1 %v3940_v5  ;;  %v1575_v27 = vadd.f32 %v1574_v11, %v279_v22  ;;  %v4145_v11 = vld [vmem:[#allocation4 + $0x2f8] sm:$0xf0]  ;;  %v4116_v5 = vor.u32 %v4686_v63, %v4113_v0  ;;  %v4207_v22 = vld [vmem:[#allocation4 + $0x368] sm:$0xf] }
 0x14c   :  { %2603 = vmatpush.bf16.msra.mxu3 %v3812_v33  ;;  %2574 = vmatpush.bf16.msrb.mxu2 %v4112_v48  ;;  %v1588_v42 = vadd.f32 %v5012_v32, %v1575_v27  ;;  %v4047_v33 = vld [vmem:[#allocation4 + $0x228] sm:$0xf]  ;;  %v4049_v27 = vld [vmem:[#allocation4 + $0x238] sm:$0xf0] }
 0x14d   :  { %v4048_v46 = vor.u32 %v4672_v36, %v4047_v33  ;;  %v4175_v33 = vld [vmem:[#allocation4 + $0x328] sm:$0xf]  ;;  %v4704_v36 = vld [vmem:[#allocation4 + $0x334] sm:$0xf0] }
 0x14e   :  { %2617 = vmatpush.bf16.msra.mxu1 %v3924_v18  ;;  %v1600_v28 = vpop.f32.mrf.mxu1  ;;  %v4223_v18 = vld [vmem:[#allocation4 + $0x388] sm:$0xf] }
 0x14f   :  { %v1601_v37 = vadd.f32 %v1600_v28, %v1588_v42  ;;  %v4224_v48 = vor.u32 %v4716_v19, %v4223_v18  ;;  %v4191_v28 = vld [vmem:[#allocation4 + $0x348] sm:$0xf]  ;;  %v4736_v18 = vld [vmem:[#allocation6 + $0x38] sm:$0xff] }
 0x150   :  { %2604 = vmatpush.bf16.msra.mxu3 %v3796_v52  ;;  %2575 = vmatpush.bf16.msrb.mxu2 %v4096_v24  ;;  %v4148_v52 = vor.u32 %v4694_v14, %v4145_v11  ;;  %v4068_v24 = vor.u32 %v4674_v21, %v4065_v2  ;;  %v4722_v14 = vld [vmem:[#allocation4 + $0x3cc] sm:$0xf]  ;;  %v4257_v11 = vld [vmem:[#allocation4 + $0x3d8] sm:$0xf0] }
 0x152   :  { %2618 = vmatpush.bf16.msra.mxu1 %v3908_v23  ;;  %v1639_v6 = vpop.f32.mrf.mxu0  ;;  %v4712_v23 = vld [vmem:[#allocation4 + $0x374] sm:$0xf0] }
 0x153   :  { %2528 = vmatmul.bf16.vlgmr.msra.gmra.mxu2 %v5015_v1  ;;  %v4208_v25 = vor.u32 %v4712_v23, %v4207_v22  ;;  %v4734_v22 = vld [vmem:[#allocation6 + $0x28] sm:$0xff] }
 0x154   :  { %2605 = vmatpush.bf16.msra.mxu3 %v3780_v38  ;;  %2576 = vmatpush.bf16.msrb.mxu2 %v4080_v30  ;;  %v4708_v30 = vld [vmem:[#allocation4 + $0x354] sm:$0xf0] }
 0x155   :  { %2619 = vmatmul.bf16.vlgmr.msra.gmra.mxu1 %v4991_v9  ;;  %v4668_v9 = vld [vmem:[#allocation4 + $0x214] sm:$0xf0]  ;;  %v4192_v42 = vor.u32 %v4708_v30, %v4191_v28  ;;  %v4731_v30 = vld [vmem:[#allocation6 + $0x10] sm:$0xff] }
 0x156   :  { %v1602_v40 = vpop.f32.mrf.mxu1  ;;  %v4032_v51 = vor.u32 %v4668_v9, %v4031_v47  ;;  %v4273_v47 = vld [vmem:[#allocation4 + $0x3f8] sm:$0xf0] }
 0x157   :  { %2606 = vmatmul.bf16.vlgmr.msra.gmra.mxu3 %v4984_v53  ;;  %v4676_v53 = vld [vmem:[#allocation4 + $0x254] sm:$0xf0]  ;;  %v4176_v40 = vor.u32 %v4704_v36, %v4175_v33  ;;  %v1797_v36 = vperm.slane %v5033_v60, 3 }
 0x158   :  { %v4064_v35 = vor.u32 %v4676_v53, %v4063_v31  ;;  %v4052_v53 = vor.u32 %v4670_v26, %v4049_v27  ;;  %2918 = vmatpush.bf16.msrb.mxu3 %v4736_v18  ;;  %v4732_v27 = vld [vmem:[#allocation6 + $0x18] sm:$0xff]  ;;  %v4754_v18 = vld [vmem:[#allocation6 + $0xc8] sm:$0xff] }
 0x159   :  { %v4744_v28 = vld [vmem:[#allocation6 + $0x78] sm:$0xff] }
 0x15a   :  { %v1613_v43 = vpop.f32.mrf.mxu3  ;;  %v1626_v45 = vpop.f32.mrf.mxu2  ;;  %2577 = vmatpush.bf16.msrb.mxu2 %v4064_v35  ;;  %v4033_v35 = vld [vmem:[#allocation4 + $0x218] sm:$0xf0]  ;;  %2931 = vmatpush.bf16.msrb.mxu1 %v4744_v28 }
 0x15b   :  { %v1614_v44 = vadd.f32 %v1613_v43, %v1601_v37  ;;  %v1641_v32 = vpop.f32.mrf.mxu0  ;;  %v4159_v43 = vld [vmem:[#allocation4 + $0x308] sm:$0xf] }
 0x15c   :  { %v4260_v32 = vor.u32 %v4722_v14, %v4257_v11  ;;  %v4738_v14 = vld [vmem:[#allocation6 + $0x48] sm:$0xff] }
 0x15d   :  { %v1627_v20 = vadd.f32 %v1626_v45, %v1614_v44  ;;  %v4700_v44 = vld [vmem:[#allocation4 + $0x314] sm:$0xf0]  ;;  %v4750_v11 = vld [vmem:[#allocation6 + $0xa8] sm:$0xff] }
 0x15e   :  { %2578 = vmatpush.bf16.msrb.mxu2 %v4048_v46  ;;  %v1652_v54 = vpop.f32.mrf.mxu1  ;;  %v4726_v46 = vld [vmem:[#allocation4 + $0x3ec] sm:$0xf]  ;;  %v4160_v9 = vor.u32 %v4700_v44, %v4159_v43 }
 0x15f   :  { %v1640_v49 = vadd.f32 %v1639_v6, %v1627_v20  ;;  %v4666_v6 = vld [vmem:[#allocation4 + $0x20c] sm:$0xf]  ;;  %v4276_v20 = vor.u32 %v4726_v46, %v4273_v47  ;;  %v4751_v46 = vld [vmem:[#allocation6 + $0xb0] sm:$0xff] }
 0x160   :  { %v4036_v37 = vor.u32 %v4666_v6, %v4033_v35  ;;  %v4729_v6 = vld [vmem:[#allocation6] sm:$0xff] }
 0x161   :  { %v1653_v56 = vadd.f32 %v1652_v54, %v1640_v49  ;;  %v4718_v49 = vld [vmem:[#allocation4 + $0x3ac] sm:$0xf]  ;;  %v4741_v35 = vld [vmem:[#allocation6 + $0x60] sm:$0xff] }
 0x162   :  { %v1615_v58 = vpop.f32.mrf.mxu3  ;;  %v1628_v34 = vpop.f32.mrf.mxu2  ;;  %2579 = vmatpush.bf16.msrb.mxu2 %v4032_v51  ;;  %v4241_v51 = vld [vmem:[#allocation4 + $0x3b8] sm:$0xf0]  ;;  %v4714_v54 = vld [vmem:[#allocation4 + $0x38c] sm:$0xf] }
 0x163   :  { %v1659_v61 = vmax.f32 %v1653_v56, 0.0  ;;  %v1794_v56 = vperm.slane %v5033_v60, 0  ;;  %v4710_v58 = vld [vmem:[#allocation4 + $0x36c] sm:$0xf] }
 0x164   :  { %v4212_v59 = vor.u32 %v4710_v58, %v4209_v29  ;;  %v4746_v58 = vld [vmem:[#allocation6 + $0x88] sm:$0xff] }
 0x165   :  { %v5023_v38 = vpack.c.bf16 %v1659_v61, %v1659_v61  ;;  %2580 = vmatmul.bf16.vlgmr.msrb.gmra.mxu2 %v5015_v1  ;;  %v4706_v61 = vld [vmem:[#allocation4 + $0x34c] sm:$0xf] }
 0x166   :  { %2624 = vmatpush.bf16.msra.mxu2 %v4148_v52  ;;  %v1654_v7 = vpop.f32.mrf.mxu1  ;;  %v4244_v52 = vor.u32 %v4718_v49, %v4241_v51  ;;  %v4737_v49 = vld [vmem:[#allocation6 + $0x40] sm:$0xff] }
 0x167   :  { %2489 = vmatmul.bf16.vlgmr.msrb.gmra.mxu0 %v5023_v38  ;;  %v4749_v51 = vld [vmem:[#allocation6 + $0xa0] sm:$0xff] }
 0x168   :  { %2585 = vmatpush.bf16.msrb.mxu0 %v4272_v62 }
 0x16a   :  { %2625 = vmatpush.bf16.msra.mxu2 %v4132_v39  ;;  %v4193_v39 = vld [vmem:[#allocation4 + $0x358] sm:$0xf0] }
 0x16b   :  { %v4196_v3 = vor.u32 %v4706_v61, %v4193_v39  ;;  %v4745_v61 = vld [vmem:[#allocation6 + $0x80] sm:$0xff]  ;;  %v4760_v39 = vld [vmem:[#allocation6 + $0xf8] sm:$0xff] }
 0x16c   :  { %2586 = vmatpush.bf16.msrb.mxu0 %v4256_v8  ;;  %v4698_v8 = vld [vmem:[#allocation4 + $0x30c] sm:$0xf] }
 0x16d   :  { %v4164_v12 = vor.u32 %v4698_v8, %v4161_v10  ;;  %v4757_v8 = vld [vmem:[#allocation6 + $0xe0] sm:$0xff] }
 0x16e   :  { %2626 = vmatpush.bf16.msra.mxu2 %v4116_v5  ;;  %v4177_v5 = vld [vmem:[#allocation4 + $0x338] sm:$0xf0] }
 0x16f   :  { %v4180_v7 = vor.u32 %v4702_v4, %v4177_v5  ;;  %v4758_v5 = vld [vmem:[#allocation6 + $0xe8] sm:$0xff] }
 0x170   :  { %2587 = vmatpush.bf16.msrb.mxu0 %v4240_v15 }
 0x172   :  { %2627 = vmatpush.bf16.msra.mxu2 %v4100_v13  ;;  %v1795_v13 = vperm.slane %v5033_v60, 1 }
 0x174   :  { %2588 = vmatpush.bf16.msrb.mxu0 %v4224_v48  ;;  %v4735_v48 = vld [vmem:[#allocation6 + $0x30] sm:$0xff] }
 0x175   :  { %2919 = vmatpush.bf16.msrb.mxu3 %v4735_v48 }
 0x176   :  { %2628 = vmatpush.bf16.msra.mxu2 %v4084_v57  ;;  %v1796_v57 = vperm.slane %v5033_v60, 2  ;;  %v4747_v60 = vld [vmem:[#allocation6 + $0x90] sm:$0xff] }
 0x177   :  { %2541 = vmatmul.bf16.vlgmr.msra.gmra.mxu0 %v5023_v38 }
 0x178   :  { %2589 = vmatpush.bf16.msrb.mxu0 %v4208_v25  ;;  %v4733_v25 = vld [vmem:[#allocation6 + $0x20] sm:$0xff] }
 0x179   :  { %2920 = vmatpush.bf16.msrb.mxu3 %v4734_v22 }
 0x17a   :  { %v2451_v31 = vpop.f32.mrf.mxu3  ;;  %2629 = vmatpush.bf16.msra.mxu2 %v4068_v24 }
 0x17b   :  { %v2452_v34 = vadd.f32 %v2451_v31, %v1794_v56  ;;  %v4743_v31 = vld [vmem:[#allocation6 + $0x70] sm:$0xff] }
 0x17c   :  { %2590 = vmatpush.bf16.msrb.mxu0 %v4192_v42  ;;  %2932 = vmatpush.bf16.msrb.mxu1 %v4743_v31  ;;  %v4742_v42 = vld [vmem:[#allocation6 + $0x68] sm:$0xff] }
 0x17d   :  { %2921 = vmatpush.bf16.msrb.mxu3 %v4733_v25 }
 0x17e   :  { %2630 = vmatpush.bf16.msra.mxu2 %v4052_v53  ;;  %v4730_v53 = vld [vmem:[#allocation6 + $0x8] sm:$0xff] }
 0x180   :  { %2591 = vmatpush.bf16.msrb.mxu0 %v4176_v40  ;;  %2933 = vmatpush.bf16.msrb.mxu1 %v4742_v42  ;;  %v4752_v40 = vld [vmem:[#allocation6 + $0xb8] sm:$0xff] }
 0x181   :  { %2922 = vmatpush.bf16.msrb.mxu3 %v4732_v27 }
 0x182   :  { %v2453_v45 = vpop.f32.mrf.mxu3  ;;  %2631 = vmatpush.bf16.msra.mxu2 %v4036_v37  ;;  %v4740_v37 = vld [vmem:[#allocation6 + $0x58] sm:$0xff] }
 0x183   :  { %v4739_v45 = vld [vmem:[#allocation6 + $0x50] sm:$0xff] }
 0x184   :  { %2592 = vmatpush.bf16.msrb.mxu0 %v4160_v9  ;;  %2934 = vmatpush.bf16.msrb.mxu1 %v4741_v35 }
 0x185   :  { %2632 = vmatmul.bf16.vlgmr.msra.gmra.mxu2 %v5015_v1  ;;  %v4228_v1 = vor.u32 %v4714_v54, %v4225_v55  ;;  %2923 = vmatpush.bf16.msrb.mxu3 %v4731_v30  ;;  %v4748_v55 = vld [vmem:[#allocation6 + $0x98] sm:$0xff] }
 0x186   :  { %2944 = vmatpush.bf16.msrb.mxu2 %v4752_v40 }
 0x187   :  { %2593 = vmatmul.bf16.vlgmr.msrb.gmra.mxu0 %v5023_v38 }
 0x188   :  { %2637 = vmatpush.bf16.msra.mxu0 %v4276_v20  ;;  %2935 = vmatpush.bf16.msrb.mxu1 %v4740_v37 }
 0x189   :  { %2924 = vmatpush.bf16.msrb.mxu3 %v4730_v53 }
 0x18a   :  { %v2464_v62 = vpop.f32.mrf.mxu1  ;;  %2945 = vmatpush.bf16.msrb.mxu2 %v4751_v46 }
 0x18b   :  { %v5036_v0 = vadd.f32 %v2464_v62, %v2452_v34 }
 0x18c   :  { %2638 = vmatpush.bf16.msra.mxu0 %v4260_v32  ;;  %2936 = vmatpush.bf16.msrb.mxu1 %v4739_v45 }
 0x18d   :  { %2925 = vmatpush.bf16.msrb.mxu3 %v4729_v6 }
 0x18e   :  { %2946 = vmatpush.bf16.msrb.mxu2 %v4750_v11 }
 0x190   :  { %2639 = vmatpush.bf16.msra.mxu0 %v4244_v52  ;;  %2937 = vmatpush.bf16.msrb.mxu1 %v4738_v14 }
 0x192   :  { %v2466_v50 = vpop.f32.mrf.mxu1  ;;  %2947 = vmatpush.bf16.msrb.mxu2 %v4749_v51 }
 0x194   :  { %2640 = vmatpush.bf16.msra.mxu0 %v4228_v1  ;;  %2938 = vmatpush.bf16.msrb.mxu1 %v4737_v49 }
 0x196   :  { %2948 = vmatpush.bf16.msrb.mxu2 %v4748_v55 }
 0x198   :  { %2641 = vmatpush.bf16.msra.mxu0 %v4212_v59 }
 0x19a   :  { %v2503_v63 = vpop.f32.mrf.mxu3  ;;  %v2516_v16 = vpop.f32.mrf.mxu1  ;;  %2949 = vmatpush.bf16.msrb.mxu2 %v4747_v60 }
 0x19b   :  { %v2504_v15 = vadd.f32 %v2503_v63, %v1795_v13 }
 0x19c   :  { %2642 = vmatpush.bf16.msra.mxu0 %v4196_v3  ;;  %v4759_v3 = vld [vmem:[#allocation6 + $0xf0] sm:$0xff] }
 0x19d   :  { %v5039_v17 = vadd.f32 %v2516_v16, %v2504_v15  ;;  %v4755_v15 = vld [vmem:[#allocation6 + $0xd0] sm:$0xff] }
 0x19e   :  { %2950 = vmatpush.bf16.msrb.mxu2 %v4746_v58 }
 0x1a0   :  { %2643 = vmatpush.bf16.msra.mxu0 %v4180_v7 }
 0x1a2   :  { %v2505_v41 = vpop.f32.mrf.mxu3  ;;  %v2518_v19 = vpop.f32.mrf.mxu1  ;;  %2951 = vmatpush.bf16.msrb.mxu2 %v4745_v61 }
 0x1a3   :  { %v4756_v41 = vld [vmem:[#allocation6 + $0xd8] sm:$0xff] }
 0x1a4   :  { %2644 = vmatpush.bf16.msra.mxu0 %v4164_v12 }
 0x1a7   :  { %2645 = vmatmul.bf16.vlgmr.msra.gmra.mxu0 %v5023_v38 }
 0x1a8   :  { %2957 = vmatpush.bf16.msrb.mxu0 %v4760_v39 }
 0x1ac   :  { %2958 = vmatpush.bf16.msrb.mxu0 %v4759_v3 }
 0x1b0   :  { %2959 = vmatpush.bf16.msrb.mxu0 %v4758_v5 }
 0x1b2   :  { %v2568_v23 = vpop.f32.mrf.mxu1 }
 0x1b4   :  { %2960 = vmatpush.bf16.msrb.mxu0 %v4757_v8 }
 0x1b8   :  { %2961 = vmatpush.bf16.msrb.mxu0 %v4756_v41 }
 0x1ba   :  { %v2555_v21 = vpop.f32.mrf.mxu3  ;;  %v2570_v38 = vpop.f32.mrf.mxu1 }
 0x1bb   :  { %v2556_v2 = vadd.f32 %v2555_v21, %v1796_v57  ;;  %v4753_v57 = vld [vmem:[#allocation6 + $0xc0] sm:$0xff] }
 0x1bc   :  { %2962 = vmatpush.bf16.msrb.mxu0 %v4755_v15 }
 0x1bd   :  { %v5043_v24 = vadd.f32 %v2568_v23, %v2556_v2 }
 0x1c0   :  { %2963 = vmatpush.bf16.msrb.mxu0 %v4754_v18 }
 0x1c2   :  { %v2557_v26 = vpop.f32.mrf.mxu3 }
 0x1c4   :  { %2964 = vmatpush.bf16.msrb.mxu0 %v4753_v57 }
 0x1c6   :  { %v2477_v33 = vpop.f32.mrf.mxu2 }
 0x1c7   :  { %v2478_v56 = vadd.f32 %v2477_v33, %v5036_v0 }
 0x1ce   :  { %v2479_v9 = vpop.f32.mrf.mxu2 }
 0x1d2   :  { %v2620_v47 = vpop.f32.mrf.mxu1 }
 0x1d6   :  { %v2529_v54 = vpop.f32.mrf.mxu2 }
 0x1d7   :  { %v2530_v0 = vadd.f32 %v2529_v54, %v5039_v17 }
 0x1da   :  { %v2607_v43 = vpop.f32.mrf.mxu3  ;;  %v2622_v52 = vpop.f32.mrf.mxu1 }
 0x1db   :  { %v2608_v44 = vadd.f32 %v2607_v43, %v1797_v36  ;;  %v4768_v36 = vld [vmem:[%s5064_s6] ss:$0 sm:$0xff] }
 0x1dd   :  { %v5046_v20 = vadd.f32 %v2620_v47, %v2608_v44 }
 0x1de   :  { %v2531_v1 = vpop.f32.mrf.mxu2 }
 0x1e2   :  { %v2609_v32 = vpop.f32.mrf.mxu3 }
 0x1e4   :  { %v2490_v29 = vpop.f32.mrf.mxu0 }
 0x1e5   :  { %v2491_v59 = vadd.f32 %v2490_v29, %v2478_v56 }
 0x1e7   :  { %v2650_v34 = vmax.f32 %v2491_v59, 0.0 }
 0x1e8   :  { %v2581_v62 = vpop.f32.mrf.mxu2 }
 0x1e9   :  { %v2654_v63 = vpack.c.bf16 %v2650_v34, %v2650_v34  ;;  %v2582_v19 = vadd.f32 %v2581_v62, %v5043_v24 }
 0x1eb   :  { %2926 = vmatmul.bf16.vlgmr.msrb.gmra.mxu3 %v2654_v63 }
 0x1ec   :  { %v2492_v4 = vpop.f32.mrf.mxu0 }
 0x1f0   :  { %v2583_v7 = vpop.f32.mrf.mxu2 }
 0x1f4   :  { %v2542_v10 = vpop.f32.mrf.mxu0 }
 0x1f5   :  { %v2543_v50 = vadd.f32 %v2542_v10, %v2530_v0 }
 0x1f7   :  { %v2651_v12 = vmax.f32 %v2543_v50, 0.0 }
 0x1f9   :  { %v2655_v13 = vpack.c.bf16 %v2651_v12, %v2651_v12 }
 0x1fb   :  { %2939 = vmatmul.bf16.vlgmr.msrb.gmra.mxu1 %v2655_v13 }
 0x1fc   :  { %v2544_v16 = vpop.f32.mrf.mxu0 }
 0x204   :  { %v2594_v48 = vpop.f32.mrf.mxu0 }
 0x205   :  { %v2595_v21 = vadd.f32 %v2594_v48, %v2582_v19 }
 0x207   :  { %v2652_v17 = vmax.f32 %v2595_v21, 0.0 }
 0x208   :  { %v2633_v2 = vpop.f32.mrf.mxu2 }
 0x209   :  { %v2656_v22 = vpack.c.bf16 %v2652_v17, %v2652_v17  ;;  %v2634_v26 = vadd.f32 %v2633_v2, %v5046_v20 }
 0x20b   :  { %2952 = vmatmul.bf16.vlgmr.msrb.gmra.mxu2 %v2656_v22 }
 0x20c   :  { %v2596_v23 = vpop.f32.mrf.mxu0 }
 0x210   :  { %v2635_v25 = vpop.f32.mrf.mxu2 }
 0x224   :  { %v2646_v27 = vpop.f32.mrf.mxu0 }
 0x225   :  { %v2647_v28 = vadd.f32 %v2646_v27, %v2634_v26 }
 0x227   :  { %v2653_v38 = vmax.f32 %v2647_v28, 0.0 }
 0x229   :  { %v2657_v30 = vpack.c.bf16 %v2653_v38, %v2653_v38 }
 0x22b   :  { %2965 = vmatmul.bf16.vlgmr.msrb.gmra.mxu0 %v2657_v30 }
 0x22c   :  { %v2648_v31 = vpop.f32.mrf.mxu0 }
 0x26e   :  { %v2927_v53 = vpop.f32.mrf.mxu3 }
 0x26f   :  { %v2928_v37 = vadd.f32 %v4768_v36, %v2927_v53 }
 0x276   :  { %v2929_v24 = vpop.f32.mrf.mxu3 }
 0x278   :  { %v2940_v42 = vpop.f32.mrf.mxu1 }
 0x279   :  { %v2941_v40 = vadd.f32 %v2940_v42, %v2928_v37 }
 0x280   :  { %v2942_v6 = vpop.f32.mrf.mxu1 }
 0x28e   :  { %v2953_v35 = vpop.f32.mrf.mxu2 }
 0x28f   :  { %v2954_v43 = vadd.f32 %v2953_v35, %v2941_v40 }
 0x296   :  { %v2955_v33 = vpop.f32.mrf.mxu2 }
 0x2a8   :  { %v2966_v44 = vpop.f32.mrf.mxu0 }
 0x2a9   :  { %v2967_v45 = vadd.f32 %v2966_v44, %v2954_v43 }
 0x2ab   :  { %2970 = vst [vmem:[%s5065_s7] sm:$0xff] %v2967_v45 }
 0x2b0   :  { %v2968_v46 = vpop.f32.mrf.mxu0 }
 0x2b1   :  { %2975 = vsyncpa [#allocation3], 1 }
 0x2b2   :  { %2976 = vsyncpa [#allocation5], 1 }

</bundles_post_ra>
